<compile_context>
chip_gen: v7x
topology: tpu7x:2x2x1
jax: 0.10.0
libtpu: 0.0.40
codegen_flags: <defaults>
</compile_context>

<pallas_src>
import functools

import jax
import jax.numpy as jnp
from jax.experimental import pallas as pl
from jax.experimental.pallas import tpu as pltpu


# ----------------------------------------------------------------------------
# Space-to-depth helpers: a 3x3 / stride-2 / pad-1 conv is exactly a
# 2x2 / stride-1 conv over the space-to-depth (2x2 blocks -> channels)
# rearrangement of the zero-padded input.  This turns the strided patch gather
# into four contiguous stride-1 window reads that the kernel does in VMEM.
# ----------------------------------------------------------------------------
def space_to_depth(x_nhwc, pad):
    n, h, w, c = x_nhwc.shape
    hp, wp = h + 2 * pad, w + 2 * pad
    eh, ew = hp % 2, wp % 2                      # pad to even (extra zeros never read)
    xp = jnp.pad(x_nhwc, ((0, 0), (pad, pad + eh), (pad, pad + ew), (0, 0)))
    hq, wq = (hp + eh) // 2, (wp + ew) // 2
    xs = xp.reshape(n, hq, 2, wq, 2, c).transpose(0, 1, 3, 2, 4, 5)
    return xs.reshape(n, hq, wq, 4 * c)


def s2d_conv_weight(w):
    """(Cout, Cin, 3, 3) torch conv weight -> (16*Cin, Cout) s2d 2x2-conv matmul weight."""
    cout, cin, kh, kw = w.shape
    assert kh == 3 and kw == 3, (kh, kw)
    wt = jnp.transpose(w, (2, 3, 1, 0))                      # (kh, kw, Cin, Cout)
    w2 = jnp.zeros((2, 2, 2, 2, cin, cout), w.dtype)         # (dh, dw, ph, pw, ci, co)
    for ih in range(3):
        for iw in range(3):
            w2 = w2.at[ih // 2, iw // 2, ih % 2, iw % 2].set(wt[ih, iw])
    return w2.reshape(16 * cin, cout)


# ----------------------------------------------------------------------------
# Pallas kernels
# ----------------------------------------------------------------------------
def _gather_patches(x_ref, patches_ref, hout, wout, c4):
    # In-VMEM im2col for the 2x2 stride-1 (space-to-depth) conv: 4 taps, each a
    # contiguous stride-1 window of the input block, copied row by row into the
    # patches scratch.  No patches tensor is ever materialized in HBM.
    for dh in range(2):
        for dw in range(2):
            t = dh * 2 + dw
            for r in range(hout):
                patches_ref[r * wout:(r + 1) * wout, t * c4:(t + 1) * c4] = (
                    x_ref[0, dh + r, dw:dw + wout, :])


def _conv1_kernel(x_ref, w_ref, b_ref, o_ref, patches_ref, *, hout, wout, c4):
    _gather_patches(x_ref, patches_ref, hout, wout, c4)
    acc = jnp.dot(patches_ref[...], w_ref[...], preferred_element_type=jnp.float32)
    acc = jnp.maximum(acc + b_ref[...], 0.0)                 # bias + ReLU in f32
    o_ref[0] = acc.astype(o_ref.dtype)


def _conv2_head_kernel(x_ref, w2_ref, b2_ref, wh_ref, bh_ref, *refs,
                       hout, wout, c4, write_features):
    if write_features:
        head_ref, feat_ref, patches_ref = refs
    else:
        head_ref, patches_ref = refs
    _gather_patches(x_ref, patches_ref, hout, wout, c4)
    feats = jnp.dot(patches_ref[...], w2_ref[...], preferred_element_type=jnp.float32)
    feats = jnp.maximum(feats + b2_ref[...], 0.0)            # (hout*wout, C2) f32
    if write_features:
        feat_ref[0] = feats.astype(feat_ref.dtype)
    # Epilogue-fused 1x1 head (heatmap + locref) while the feature tile is in VMEM.
    head = jnp.dot(feats.astype(wh_ref.dtype), wh_ref[...],
                   preferred_element_type=jnp.float32) + bh_ref[...]
    head_ref[0] = head.astype(head_ref.dtype)


_COMPILER_PARAMS = pltpu.CompilerParams(
    dimension_semantics=("parallel",),           # batch-parallel: both v7x TCs busy
    vmem_limit_bytes=32 * 1024 * 1024,
)


def conv1(x_s2d, w_flat, bias, *, hout, wout, out_dtype):
    n, hq, wq, c4 = x_s2d.shape
    cout = w_flat.shape[-1]
    kernel = functools.partial(_conv1_kernel, hout=hout, wout=wout, c4=c4)
    return pl.pallas_call(
        kernel,
        out_shape=jax.ShapeDtypeStruct((n, hout * wout, cout), out_dtype),
        grid=(n,),
        in_specs=[
            pl.BlockSpec((1, hq, wq, c4), lambda i: (i, 0, 0, 0)),
            pl.BlockSpec((4 * c4, cout), lambda i: (0, 0)),
            pl.BlockSpec((1, cout), lambda i: (0, 0)),
        ],
        out_specs=pl.BlockSpec((1, hout * wout, cout), lambda i: (i, 0, 0)),
        scratch_shapes=[pltpu.VMEM((hout * wout, 4 * c4), x_s2d.dtype)],
        compiler_params=_COMPILER_PARAMS,
    )(x_s2d, w_flat, bias.reshape(1, cout))


def conv2_with_head(h_s2d, w2_flat, b2, wh, bh, *, hout, wout, write_features):
    n, hq, wq, c4 = h_s2d.shape
    c2 = w2_flat.shape[-1]
    ch = wh.shape[-1]
    kernel = functools.partial(_conv2_head_kernel, hout=hout, wout=wout, c4=c4,
                               write_features=write_features)
    out_shape = [jax.ShapeDtypeStruct((n, hout * wout, ch), jnp.float32)]
    out_specs = [pl.BlockSpec((1, hout * wout, ch), lambda i: (i, 0, 0))]
    if write_features:
        out_shape.append(jax.ShapeDtypeStruct((n, hout * wout, c2), jnp.float32))
        out_specs.append(pl.BlockSpec((1, hout * wout, c2), lambda i: (i, 0, 0)))
    outs = pl.pallas_call(
        kernel,
        out_shape=out_shape,
        grid=(n,),
        in_specs=[
            pl.BlockSpec((1, hq, wq, c4), lambda i: (i, 0, 0, 0)),
            pl.BlockSpec((4 * c4, c2), lambda i: (0, 0)),
            pl.BlockSpec((1, c2), lambda i: (0, 0)),
            pl.BlockSpec((c2, ch), lambda i: (0, 0)),
            pl.BlockSpec((1, ch), lambda i: (0, 0)),
        ],
        out_specs=out_specs,
        scratch_shapes=[pltpu.VMEM((hout * wout, 4 * c4), h_s2d.dtype)],
        compiler_params=_COMPILER_PARAMS,
    )(h_s2d, w2_flat, b2.reshape(1, c2), wh, bh.reshape(1, ch))
    return (outs[0], outs[1]) if write_features else (outs[0], None)


# ----------------------------------------------------------------------------
# PoseModel equivalent
# ----------------------------------------------------------------------------
def _model_stride(backbone_stride, head_stride):
    if head_stride > 0:
        return backbone_stride / head_stride
    return backbone_stride * -head_stride


class PoseModelPallas:
    """Synthetic PoseModel: backbone -> (neck=None) -> heads, NCHW boundary."""

    def __init__(self, cfg, params):
        self.cfg = cfg
        self.neck = None                 # TODO(synk): neck not instantiated (None in config)
        self.output_features = False
        self.backbone_stride = 4
        self.head_strides = {"bodypart": 1}
        self._strides = {name: _model_stride(self.backbone_stride, hs)
                         for name, hs in self.head_strides.items()}
        self._num_keypoints = int(params["heads.bodypart.hm.w"].shape[0])

        # Stride-2 convs re-expressed as space-to-depth matmuls; MXU operands bf16.
        self.w1 = s2d_conv_weight(params["backbone.conv1.w"]).astype(jnp.bfloat16)
        self.b1 = params["backbone.conv1.b"].astype(jnp.float32)
        self.w2 = s2d_conv_weight(params["backbone.conv2.w"]).astype(jnp.bfloat16)
        self.b2 = params["backbone.conv2.b"].astype(jnp.float32)
        # Fused 1x1 head: heatmap + locref concatenated along Cout.
        wh = jnp.concatenate([params["heads.bodypart.hm.w"],
                              params["heads.bodypart.lr.w"]], axis=0)[:, :, 0, 0]
        self.wh = jnp.transpose(wh, (1, 0)).astype(jnp.bfloat16)       # (C2, 3K)
        self.bh = jnp.concatenate([params["heads.bodypart.hm.b"],
                                   params["heads.bodypart.lr.b"]]).astype(jnp.float32)

    def forward(self, x):
        if x.ndim == 3:                  # mirrors `if x.dim() == 3: x = x[None, :]`
            x = x[None]
        n = x.shape[0]
        h, w = x.shape[2], x.shape[3]
        x = jnp.transpose(x, (0, 2, 3, 1)).astype(jnp.bfloat16)        # NCHW->NHWC once

        # backbone conv1: 3x3 / stride 2 / pad 1 + ReLU
        h1o, w1o = (h + 2 - 3) // 2 + 1, (w + 2 - 3) // 2 + 1
        x_s2d = space_to_depth(x, pad=1)
        h1 = conv1(x_s2d, self.w1, self.b1, hout=h1o, wout=w1o,
                   out_dtype=jnp.bfloat16)                              # (N, h1o*w1o, C1)
        c1 = h1.shape[-1]

        # backbone conv2 (3x3 / s2 / p1 + ReLU) fused with the 1x1 bodypart head.
        h2o, w2o = (h1o + 2 - 3) // 2 + 1, (w1o + 2 - 3) // 2 + 1
        h1_s2d = space_to_depth(h1.reshape(n, h1o, w1o, c1), pad=1)
        head, feats = conv2_with_head(h1_s2d, self.w2, self.b2, self.wh, self.bh,
                                      hout=h2o, wout=w2o,
                                      write_features=self.output_features)

        outputs = {}
        if self.output_features:
            c2 = feats.shape[-1]
            outputs["backbone"] = dict(features=jnp.transpose(
                feats.reshape(n, h2o, w2o, c2), (0, 3, 1, 2)))
        k = self._num_keypoints
        head = head.reshape(n, h2o, w2o, 3 * k)
        outputs["bodypart"] = {
            "heatmap": jnp.transpose(head[..., :k], (0, 3, 1, 2)),      # NCHW boundary
            "locref": jnp.transpose(head[..., k:], (0, 3, 1, 2)),
        }
        return outputs

    def get_stride(self, head):
        return self._strides[head]


# ----------------------------------------------------------------------------
# Pure-XLA reference (mirrors the kernel's bf16 rounding points) and init
# ----------------------------------------------------------------------------
def reference_forward(params, x):
    f32 = jnp.float32
    xh = jnp.transpose(x, (0, 2, 3, 1)).astype(jnp.bfloat16).astype(f32)

    def conv(hin, w, b):
        w_hwio = jnp.transpose(w, (2, 3, 1, 0)).astype(jnp.bfloat16).astype(f32)
        y = jax.lax.conv_general_dilated(
            hin, w_hwio, window_strides=(2, 2), padding=((1, 1), (1, 1)),
            dimension_numbers=("NHWC", "HWIO", "NHWC"))
        return jnp.maximum(y + b.astype(f32), 0.0)

    h1 = conv(xh, params["backbone.conv1.w"], params["backbone.conv1.b"])
    h1 = h1.astype(jnp.bfloat16).astype(f32)
    feats = conv(h1, params["backbone.conv2.w"], params["backbone.conv2.b"])
    feats = feats.astype(jnp.bfloat16).astype(f32)

    def head(w, b):
        wm = w[:, :, 0, 0].astype(jnp.bfloat16).astype(f32)             # (K, C2)
        y = jnp.einsum("nhwc,kc->nhwk", feats, wm) + b.astype(f32)
        return jnp.transpose(y, (0, 3, 1, 2))

    return {"heatmap": head(params["heads.bodypart.hm.w"], params["heads.bodypart.hm.b"]),
            "locref": head(params["heads.bodypart.lr.w"], params["heads.bodypart.lr.b"])}


def init_params(key, c_in=4, c1=16, c2=32, num_keypoints=5):
    keys = jax.random.split(key, 4)

    def w(k, shape, scale=0.1):
        return (scale * jax.random.normal(k, shape)).astype(jnp.float32)

    return {
        "backbone.conv1.w": w(keys[0], (c1, c_in, 3, 3)),
        "backbone.conv1.b": jnp.zeros((c1,), jnp.float32),
        "backbone.conv2.w": w(keys[1], (c2, c1, 3, 3)),
        "backbone.conv2.b": jnp.zeros((c2,), jnp.float32),
        "heads.bodypart.hm.w": w(keys[2], (num_keypoints, c2, 1, 1)),
        "heads.bodypart.hm.b": jnp.zeros((num_keypoints,), jnp.float32),
        "heads.bodypart.lr.w": w(keys[3], (2 * num_keypoints, c2, 1, 1)),
        "heads.bodypart.lr.b": jnp.zeros((2 * num_keypoints,), jnp.float32),
    }


if __name__ == "__main__":
    key = jax.random.PRNGKey(0)
    pkey, xkey = jax.random.split(key)

    params = init_params(pkey)
    cfg = {"backbone": {"type": "SyntheticConvBackbone"},
           "heads": {"bodypart": {"type": "SyntheticHeatmapHead"}}}
    model = PoseModelPallas(cfg, params)

    # Input images: batch=2, channels=4, 16x16 spatial (NCHW, PyTorch convention).
    x = jax.random.normal(xkey, (2, 4, 16, 16), dtype=jnp.float32)

    outputs = jax.jit(model.forward)(x)
    jax.block_until_ready(outputs)

    hm = outputs["bodypart"]["heatmap"]
    lr = outputs["bodypart"]["locref"]
    assert hm.shape == (2, 5, 4, 4), hm.shape
    assert lr.shape == (2, 10, 4, 4), lr.shape
    assert model.get_stride("bodypart") == 4.0

    # Tolerance check vs. a pure-XLA reference with matching bf16 rounding points
    # (addresses the bf16-operand concern from the review; expected diff ~1e-6).
    ref = reference_forward(params, x)
    for name in ("heatmap", "locref"):
        err = float(jnp.max(jnp.abs(outputs["bodypart"][name] - ref[name])))
        assert err < 5e-3, (name, err)

    print("KERNEL_OK")
</pallas_src>

<mosaic_0001>
module attributes {stable_mosaic.version = 11 : i64} {
  func.func @_conv1_kernel(%arg0: i32, %arg1: memref<1x9x9x16xbf16, #tpu.memory_space<vmem>>, %arg2: memref<64x16xbf16, #tpu.memory_space<vmem>>, %arg3: memref<1x16xf32, #tpu.memory_space<vmem>>, %arg4: memref<1x64x16xbf16, #tpu.memory_space<vmem>>, %arg5: memref<64x64xbf16, #tpu.memory_space<vmem>>) attributes {dimension_semantics = [#tpu.dimension_semantics<parallel>], iteration_bounds = array<i64: 2>, scalar_prefetch = 0 : i64, scratch_operands = 1 : i64, tpu.core_type = #tpu.core_type<tc>, window_params = [{transform_indices = @transform_0, window_bounds = array<i64: 1, 9, 9, 16>}, {pipeline_mode = #tpu.pipeline_mode<synchronous>, transform_indices = @transform_1, window_bounds = array<i64: 64, 16>}, {pipeline_mode = #tpu.pipeline_mode<synchronous>, transform_indices = @transform_2, window_bounds = array<i64: 1, 16>}, {transform_indices = @transform_3, window_bounds = array<i64: 1, 64, 16>}]} {
    %c0 = arith.constant 0 : index
    %c0_0 = arith.constant 0 : index
    %c0_1 = arith.constant 0 : index
    %c0_2 = arith.constant 0 : index
    %0 = vector.load %arg1[%c0, %c0_0, %c0_1, %c0_2] : memref<1x9x9x16xbf16, #tpu.memory_space<vmem>>, vector<1x1x8x16xbf16>
    %1 = vector.shape_cast %0 : vector<1x1x8x16xbf16> to vector<8x16xbf16>
    %c0_3 = arith.constant 0 : index
    %c0_4 = arith.constant 0 : index
    %2 = vector.load %arg5[%c0_3, %c0_4] : memref<64x64xbf16, #tpu.memory_space<vmem>>, vector<8x16xbf16>
    tpu.vector_store %arg5[%c0_3, %c0_4], %1 {strides = array<i32>} : memref<64x64xbf16, #tpu.memory_space<vmem>>, vector<8x16xbf16>,
    %c0_5 = arith.constant 0 : index
    %c1 = arith.constant 1 : index
    %c0_6 = arith.constant 0 : index
    %c0_7 = arith.constant 0 : index
    %3 = vector.load %arg1[%c0_5, %c1, %c0_6, %c0_7] : memref<1x9x9x16xbf16, #tpu.memory_space<vmem>>, vector<1x1x8x16xbf16>
    %4 = vector.shape_cast %3 : vector<1x1x8x16xbf16> to vector<8x16xbf16>
    %c8 = arith.constant 8 : index
    %c0_8 = arith.constant 0 : index
    %5 = vector.load %arg5[%c8, %c0_8] : memref<64x64xbf16, #tpu.memory_space<vmem>>, vector<8x16xbf16>
    tpu.vector_store %arg5[%c8, %c0_8], %4 {strides = array<i32>} : memref<64x64xbf16, #tpu.memory_space<vmem>>, vector<8x16xbf16>,
    %c0_9 = arith.constant 0 : index
    %c2 = arith.constant 2 : index
    %c0_10 = arith.constant 0 : index
    %c0_11 = arith.constant 0 : index
    %6 = vector.load %arg1[%c0_9, %c2, %c0_10, %c0_11] : memref<1x9x9x16xbf16, #tpu.memory_space<vmem>>, vector<1x1x8x16xbf16>
    %7 = vector.shape_cast %6 : vector<1x1x8x16xbf16> to vector<8x16xbf16>
    %c16 = arith.constant 16 : index
    %c0_12 = arith.constant 0 : index
    %8 = vector.load %arg5[%c16, %c0_12] : memref<64x64xbf16, #tpu.memory_space<vmem>>, vector<8x16xbf16>
    tpu.vector_store %arg5[%c16, %c0_12], %7 {strides = array<i32>} : memref<64x64xbf16, #tpu.memory_space<vmem>>, vector<8x16xbf16>,
    %c0_13 = arith.constant 0 : index
    %c3 = arith.constant 3 : index
    %c0_14 = arith.constant 0 : index
    %c0_15 = arith.constant 0 : index
    %9 = vector.load %arg1[%c0_13, %c3, %c0_14, %c0_15] : memref<1x9x9x16xbf16, #tpu.memory_space<vmem>>, vector<1x1x8x16xbf16>
    %10 = vector.shape_cast %9 : vector<1x1x8x16xbf16> to vector<8x16xbf16>
    %c24 = arith.constant 24 : index
    %c0_16 = arith.constant 0 : index
    %11 = vector.load %arg5[%c24, %c0_16] : memref<64x64xbf16, #tpu.memory_space<vmem>>, vector<8x16xbf16>
    tpu.vector_store %arg5[%c24, %c0_16], %10 {strides = array<i32>} : memref<64x64xbf16, #tpu.memory_space<vmem>>, vector<8x16xbf16>,
    %c0_17 = arith.constant 0 : index
    %c4 = arith.constant 4 : index
    %c0_18 = arith.constant 0 : index
    %c0_19 = arith.constant 0 : index
    %12 = vector.load %arg1[%c0_17, %c4, %c0_18, %c0_19] : memref<1x9x9x16xbf16, #tpu.memory_space<vmem>>, vector<1x1x8x16xbf16>
    %13 = vector.shape_cast %12 : vector<1x1x8x16xbf16> to vector<8x16xbf16>
    %c32 = arith.constant 32 : index
    %c0_20 = arith.constant 0 : index
    %14 = vector.load %arg5[%c32, %c0_20] : memref<64x64xbf16, #tpu.memory_space<vmem>>, vector<8x16xbf16>
    tpu.vector_store %arg5[%c32, %c0_20], %13 {strides = array<i32>} : memref<64x64xbf16, #tpu.memory_space<vmem>>, vector<8x16xbf16>,
    %c0_21 = arith.constant 0 : index
    %c5 = arith.constant 5 : index
    %c0_22 = arith.constant 0 : index
    %c0_23 = arith.constant 0 : index
    %15 = vector.load %arg1[%c0_21, %c5, %c0_22, %c0_23] : memref<1x9x9x16xbf16, #tpu.memory_space<vmem>>, vector<1x1x8x16xbf16>
    %16 = vector.shape_cast %15 : vector<1x1x8x16xbf16> to vector<8x16xbf16>
    %c40 = arith.constant 40 : index
    %c0_24 = arith.constant 0 : index
    %17 = vector.load %arg5[%c40, %c0_24] : memref<64x64xbf16, #tpu.memory_space<vmem>>, vector<8x16xbf16>
    tpu.vector_store %arg5[%c40, %c0_24], %16 {strides = array<i32>} : memref<64x64xbf16, #tpu.memory_space<vmem>>, vector<8x16xbf16>,
    %c0_25 = arith.constant 0 : index
    %c6 = arith.constant 6 : index
    %c0_26 = arith.constant 0 : index
    %c0_27 = arith.constant 0 : index
    %18 = vector.load %arg1[%c0_25, %c6, %c0_26, %c0_27] : memref<1x9x9x16xbf16, #tpu.memory_space<vmem>>, vector<1x1x8x16xbf16>
    %19 = vector.shape_cast %18 : vector<1x1x8x16xbf16> to vector<8x16xbf16>
    %c48 = arith.constant 48 : index
    %c0_28 = arith.constant 0 : index
    %20 = vector.load %arg5[%c48, %c0_28] : memref<64x64xbf16, #tpu.memory_space<vmem>>, vector<8x16xbf16>
    tpu.vector_store %arg5[%c48, %c0_28], %19 {strides = array<i32>} : memref<64x64xbf16, #tpu.memory_space<vmem>>, vector<8x16xbf16>,
    %c0_29 = arith.constant 0 : index
    %c7 = arith.constant 7 : index
    %c0_30 = arith.constant 0 : index
    %c0_31 = arith.constant 0 : index
    %21 = vector.load %arg1[%c0_29, %c7, %c0_30, %c0_31] : memref<1x9x9x16xbf16, #tpu.memory_space<vmem>>, vector<1x1x8x16xbf16>
    %22 = vector.shape_cast %21 : vector<1x1x8x16xbf16> to vector<8x16xbf16>
    %c56 = arith.constant 56 : index
    %c0_32 = arith.constant 0 : index
    %23 = vector.load %arg5[%c56, %c0_32] : memref<64x64xbf16, #tpu.memory_space<vmem>>, vector<8x16xbf16>
    tpu.vector_store %arg5[%c56, %c0_32], %22 {strides = array<i32>} : memref<64x64xbf16, #tpu.memory_space<vmem>>, vector<8x16xbf16>,
    %c0_33 = arith.constant 0 : index
    %c0_34 = arith.constant 0 : index
    %c1_35 = arith.constant 1 : index
    %c0_36 = arith.constant 0 : index
    %24 = vector.load %arg1[%c0_33, %c0_34, %c1_35, %c0_36] : memref<1x9x9x16xbf16, #tpu.memory_space<vmem>>, vector<1x1x8x16xbf16>
    %25 = vector.shape_cast %24 : vector<1x1x8x16xbf16> to vector<8x16xbf16>
    %c0_37 = arith.constant 0 : index
    %c16_38 = arith.constant 16 : index
    %26 = vector.load %arg5[%c0_37, %c16_38] : memref<64x64xbf16, #tpu.memory_space<vmem>>, vector<8x16xbf16>
    tpu.vector_store %arg5[%c0_37, %c16_38], %25 {strides = array<i32>} : memref<64x64xbf16, #tpu.memory_space<vmem>>, vector<8x16xbf16>,
    %c0_39 = arith.constant 0 : index
    %c1_40 = arith.constant 1 : index
    %c1_41 = arith.constant 1 : index
    %c0_42 = arith.constant 0 : index
    %27 = vector.load %arg1[%c0_39, %c1_40, %c1_41, %c0_42] : memref<1x9x9x16xbf16, #tpu.memory_space<vmem>>, vector<1x1x8x16xbf16>
    %28 = vector.shape_cast %27 : vector<1x1x8x16xbf16> to vector<8x16xbf16>
    %c8_43 = arith.constant 8 : index
    %c16_44 = arith.constant 16 : index
    %29 = vector.load %arg5[%c8_43, %c16_44] : memref<64x64xbf16, #tpu.memory_space<vmem>>, vector<8x16xbf16>
    tpu.vector_store %arg5[%c8_43, %c16_44], %28 {strides = array<i32>} : memref<64x64xbf16, #tpu.memory_space<vmem>>, vector<8x16xbf16>,
    %c0_45 = arith.constant 0 : index
    %c2_46 = arith.constant 2 : index
    %c1_47 = arith.constant 1 : index
    %c0_48 = arith.constant 0 : index
    %30 = vector.load %arg1[%c0_45, %c2_46, %c1_47, %c0_48] : memref<1x9x9x16xbf16, #tpu.memory_space<vmem>>, vector<1x1x8x16xbf16>
    %31 = vector.shape_cast %30 : vector<1x1x8x16xbf16> to vector<8x16xbf16>
    %c16_49 = arith.constant 16 : index
    %c16_50 = arith.constant 16 : index
    %32 = vector.load %arg5[%c16_49, %c16_50] : memref<64x64xbf16, #tpu.memory_space<vmem>>, vector<8x16xbf16>
    tpu.vector_store %arg5[%c16_49, %c16_50], %31 {strides = array<i32>} : memref<64x64xbf16, #tpu.memory_space<vmem>>, vector<8x16xbf16>,
    %c0_51 = arith.constant 0 : index
    %c3_52 = arith.constant 3 : index
    %c1_53 = arith.constant 1 : index
    %c0_54 = arith.constant 0 : index
    %33 = vector.load %arg1[%c0_51, %c3_52, %c1_53, %c0_54] : memref<1x9x9x16xbf16, #tpu.memory_space<vmem>>, vector<1x1x8x16xbf16>
    %34 = vector.shape_cast %33 : vector<1x1x8x16xbf16> to vector<8x16xbf16>
    %c24_55 = arith.constant 24 : index
    %c16_56 = arith.constant 16 : index
    %35 = vector.load %arg5[%c24_55, %c16_56] : memref<64x64xbf16, #tpu.memory_space<vmem>>, vector<8x16xbf16>
    tpu.vector_store %arg5[%c24_55, %c16_56], %34 {strides = array<i32>} : memref<64x64xbf16, #tpu.memory_space<vmem>>, vector<8x16xbf16>,
    %c0_57 = arith.constant 0 : index
    %c4_58 = arith.constant 4 : index
    %c1_59 = arith.constant 1 : index
    %c0_60 = arith.constant 0 : index
    %36 = vector.load %arg1[%c0_57, %c4_58, %c1_59, %c0_60] : memref<1x9x9x16xbf16, #tpu.memory_space<vmem>>, vector<1x1x8x16xbf16>
    %37 = vector.shape_cast %36 : vector<1x1x8x16xbf16> to vector<8x16xbf16>
    %c32_61 = arith.constant 32 : index
    %c16_62 = arith.constant 16 : index
    %38 = vector.load %arg5[%c32_61, %c16_62] : memref<64x64xbf16, #tpu.memory_space<vmem>>, vector<8x16xbf16>
    tpu.vector_store %arg5[%c32_61, %c16_62], %37 {strides = array<i32>} : memref<64x64xbf16, #tpu.memory_space<vmem>>, vector<8x16xbf16>,
    %c0_63 = arith.constant 0 : index
    %c5_64 = arith.constant 5 : index
    %c1_65 = arith.constant 1 : index
    %c0_66 = arith.constant 0 : index
    %39 = vector.load %arg1[%c0_63, %c5_64, %c1_65, %c0_66] : memref<1x9x9x16xbf16, #tpu.memory_space<vmem>>, vector<1x1x8x16xbf16>
    %40 = vector.shape_cast %39 : vector<1x1x8x16xbf16> to vector<8x16xbf16>
    %c40_67 = arith.constant 40 : index
    %c16_68 = arith.constant 16 : index
    %41 = vector.load %arg5[%c40_67, %c16_68] : memref<64x64xbf16, #tpu.memory_space<vmem>>, vector<8x16xbf16>
    tpu.vector_store %arg5[%c40_67, %c16_68], %40 {strides = array<i32>} : memref<64x64xbf16, #tpu.memory_space<vmem>>, vector<8x16xbf16>,
    %c0_69 = arith.constant 0 : index
    %c6_70 = arith.constant 6 : index
    %c1_71 = arith.constant 1 : index
    %c0_72 = arith.constant 0 : index
    %42 = vector.load %arg1[%c0_69, %c6_70, %c1_71, %c0_72] : memref<1x9x9x16xbf16, #tpu.memory_space<vmem>>, vector<1x1x8x16xbf16>
    %43 = vector.shape_cast %42 : vector<1x1x8x16xbf16> to vector<8x16xbf16>
    %c48_73 = arith.constant 48 : index
    %c16_74 = arith.constant 16 : index
    %44 = vector.load %arg5[%c48_73, %c16_74] : memref<64x64xbf16, #tpu.memory_space<vmem>>, vector<8x16xbf16>
    tpu.vector_store %arg5[%c48_73, %c16_74], %43 {strides = array<i32>} : memref<64x64xbf16, #tpu.memory_space<vmem>>, vector<8x16xbf16>,
    %c0_75 = arith.constant 0 : index
    %c7_76 = arith.constant 7 : index
    %c1_77 = arith.constant 1 : index
    %c0_78 = arith.constant 0 : index
    %45 = vector.load %arg1[%c0_75, %c7_76, %c1_77, %c0_78] : memref<1x9x9x16xbf16, #tpu.memory_space<vmem>>, vector<1x1x8x16xbf16>
    %46 = vector.shape_cast %45 : vector<1x1x8x16xbf16> to vector<8x16xbf16>
    %c56_79 = arith.constant 56 : index
    %c16_80 = arith.constant 16 : index
    %47 = vector.load %arg5[%c56_79, %c16_80] : memref<64x64xbf16, #tpu.memory_space<vmem>>, vector<8x16xbf16>
    tpu.vector_store %arg5[%c56_79, %c16_80], %46 {strides = array<i32>} : memref<64x64xbf16, #tpu.memory_space<vmem>>, vector<8x16xbf16>,
    %c0_81 = arith.constant 0 : index
    %c1_82 = arith.constant 1 : index
    %c0_83 = arith.constant 0 : index
    %c0_84 = arith.constant 0 : index
    %48 = vector.load %arg1[%c0_81, %c1_82, %c0_83, %c0_84] : memref<1x9x9x16xbf16, #tpu.memory_space<vmem>>, vector<1x1x8x16xbf16>
    %49 = vector.shape_cast %48 : vector<1x1x8x16xbf16> to vector<8x16xbf16>
    %c0_85 = arith.constant 0 : index
    %c32_86 = arith.constant 32 : index
    %50 = vector.load %arg5[%c0_85, %c32_86] : memref<64x64xbf16, #tpu.memory_space<vmem>>, vector<8x16xbf16>
    tpu.vector_store %arg5[%c0_85, %c32_86], %49 {strides = array<i32>} : memref<64x64xbf16, #tpu.memory_space<vmem>>, vector<8x16xbf16>,
    %c0_87 = arith.constant 0 : index
    %c2_88 = arith.constant 2 : index
    %c0_89 = arith.constant 0 : index
    %c0_90 = arith.constant 0 : index
    %51 = vector.load %arg1[%c0_87, %c2_88, %c0_89, %c0_90] : memref<1x9x9x16xbf16, #tpu.memory_space<vmem>>, vector<1x1x8x16xbf16>
    %52 = vector.shape_cast %51 : vector<1x1x8x16xbf16> to vector<8x16xbf16>
    %c8_91 = arith.constant 8 : index
    %c32_92 = arith.constant 32 : index
    %53 = vector.load %arg5[%c8_91, %c32_92] : memref<64x64xbf16, #tpu.memory_space<vmem>>, vector<8x16xbf16>
    tpu.vector_store %arg5[%c8_91, %c32_92], %52 {strides = array<i32>} : memref<64x64xbf16, #tpu.memory_space<vmem>>, vector<8x16xbf16>,
    %c0_93 = arith.constant 0 : index
    %c3_94 = arith.constant 3 : index
    %c0_95 = arith.constant 0 : index
    %c0_96 = arith.constant 0 : index
    %54 = vector.load %arg1[%c0_93, %c3_94, %c0_95, %c0_96] : memref<1x9x9x16xbf16, #tpu.memory_space<vmem>>, vector<1x1x8x16xbf16>
    %55 = vector.shape_cast %54 : vector<1x1x8x16xbf16> to vector<8x16xbf16>
    %c16_97 = arith.constant 16 : index
    %c32_98 = arith.constant 32 : index
    %56 = vector.load %arg5[%c16_97, %c32_98] : memref<64x64xbf16, #tpu.memory_space<vmem>>, vector<8x16xbf16>
    tpu.vector_store %arg5[%c16_97, %c32_98], %55 {strides = array<i32>} : memref<64x64xbf16, #tpu.memory_space<vmem>>, vector<8x16xbf16>,
    %c0_99 = arith.constant 0 : index
    %c4_100 = arith.constant 4 : index
    %c0_101 = arith.constant 0 : index
    %c0_102 = arith.constant 0 : index
    %57 = vector.load %arg1[%c0_99, %c4_100, %c0_101, %c0_102] : memref<1x9x9x16xbf16, #tpu.memory_space<vmem>>, vector<1x1x8x16xbf16>
    %58 = vector.shape_cast %57 : vector<1x1x8x16xbf16> to vector<8x16xbf16>
    %c24_103 = arith.constant 24 : index
    %c32_104 = arith.constant 32 : index
    %59 = vector.load %arg5[%c24_103, %c32_104] : memref<64x64xbf16, #tpu.memory_space<vmem>>, vector<8x16xbf16>
    tpu.vector_store %arg5[%c24_103, %c32_104], %58 {strides = array<i32>} : memref<64x64xbf16, #tpu.memory_space<vmem>>, vector<8x16xbf16>,
    %c0_105 = arith.constant 0 : index
    %c5_106 = arith.constant 5 : index
    %c0_107 = arith.constant 0 : index
    %c0_108 = arith.constant 0 : index
    %60 = vector.load %arg1[%c0_105, %c5_106, %c0_107, %c0_108] : memref<1x9x9x16xbf16, #tpu.memory_space<vmem>>, vector<1x1x8x16xbf16>
    %61 = vector.shape_cast %60 : vector<1x1x8x16xbf16> to vector<8x16xbf16>
    %c32_109 = arith.constant 32 : index
    %c32_110 = arith.constant 32 : index
    %62 = vector.load %arg5[%c32_109, %c32_110] : memref<64x64xbf16, #tpu.memory_space<vmem>>, vector<8x16xbf16>
    tpu.vector_store %arg5[%c32_109, %c32_110], %61 {strides = array<i32>} : memref<64x64xbf16, #tpu.memory_space<vmem>>, vector<8x16xbf16>,
    %c0_111 = arith.constant 0 : index
    %c6_112 = arith.constant 6 : index
    %c0_113 = arith.constant 0 : index
    %c0_114 = arith.constant 0 : index
    %63 = vector.load %arg1[%c0_111, %c6_112, %c0_113, %c0_114] : memref<1x9x9x16xbf16, #tpu.memory_space<vmem>>, vector<1x1x8x16xbf16>
    %64 = vector.shape_cast %63 : vector<1x1x8x16xbf16> to vector<8x16xbf16>
    %c40_115 = arith.constant 40 : index
    %c32_116 = arith.constant 32 : index
    %65 = vector.load %arg5[%c40_115, %c32_116] : memref<64x64xbf16, #tpu.memory_space<vmem>>, vector<8x16xbf16>
    tpu.vector_store %arg5[%c40_115, %c32_116], %64 {strides = array<i32>} : memref<64x64xbf16, #tpu.memory_space<vmem>>, vector<8x16xbf16>,
    %c0_117 = arith.constant 0 : index
    %c7_118 = arith.constant 7 : index
    %c0_119 = arith.constant 0 : index
    %c0_120 = arith.constant 0 : index
    %66 = vector.load %arg1[%c0_117, %c7_118, %c0_119, %c0_120] : memref<1x9x9x16xbf16, #tpu.memory_space<vmem>>, vector<1x1x8x16xbf16>
    %67 = vector.shape_cast %66 : vector<1x1x8x16xbf16> to vector<8x16xbf16>
    %c48_121 = arith.constant 48 : index
    %c32_122 = arith.constant 32 : index
    %68 = vector.load %arg5[%c48_121, %c32_122] : memref<64x64xbf16, #tpu.memory_space<vmem>>, vector<8x16xbf16>
    tpu.vector_store %arg5[%c48_121, %c32_122], %67 {strides = array<i32>} : memref<64x64xbf16, #tpu.memory_space<vmem>>, vector<8x16xbf16>,
    %c0_123 = arith.constant 0 : index
    %c8_124 = arith.constant 8 : index
    %c0_125 = arith.constant 0 : index
    %c0_126 = arith.constant 0 : index
    %69 = vector.load %arg1[%c0_123, %c8_124, %c0_125, %c0_126] : memref<1x9x9x16xbf16, #tpu.memory_space<vmem>>, vector<1x1x8x16xbf16>
    %70 = vector.shape_cast %69 : vector<1x1x8x16xbf16> to vector<8x16xbf16>
    %c56_127 = arith.constant 56 : index
    %c32_128 = arith.constant 32 : index
    %71 = vector.load %arg5[%c56_127, %c32_128] : memref<64x64xbf16, #tpu.memory_space<vmem>>, vector<8x16xbf16>
    tpu.vector_store %arg5[%c56_127, %c32_128], %70 {strides = array<i32>} : memref<64x64xbf16, #tpu.memory_space<vmem>>, vector<8x16xbf16>,
    %c0_129 = arith.constant 0 : index
    %c1_130 = arith.constant 1 : index
    %c1_131 = arith.constant 1 : index
    %c0_132 = arith.constant 0 : index
    %72 = vector.load %arg1[%c0_129, %c1_130, %c1_131, %c0_132] : memref<1x9x9x16xbf16, #tpu.memory_space<vmem>>, vector<1x1x8x16xbf16>
    %73 = vector.shape_cast %72 : vector<1x1x8x16xbf16> to vector<8x16xbf16>
    %c0_133 = arith.constant 0 : index
    %c48_134 = arith.constant 48 : index
    %74 = vector.load %arg5[%c0_133, %c48_134] : memref<64x64xbf16, #tpu.memory_space<vmem>>, vector<8x16xbf16>
    tpu.vector_store %arg5[%c0_133, %c48_134], %73 {strides = array<i32>} : memref<64x64xbf16, #tpu.memory_space<vmem>>, vector<8x16xbf16>,
    %c0_135 = arith.constant 0 : index
    %c2_136 = arith.constant 2 : index
    %c1_137 = arith.constant 1 : index
    %c0_138 = arith.constant 0 : index
    %75 = vector.load %arg1[%c0_135, %c2_136, %c1_137, %c0_138] : memref<1x9x9x16xbf16, #tpu.memory_space<vmem>>, vector<1x1x8x16xbf16>
    %76 = vector.shape_cast %75 : vector<1x1x8x16xbf16> to vector<8x16xbf16>
    %c8_139 = arith.constant 8 : index
    %c48_140 = arith.constant 48 : index
    %77 = vector.load %arg5[%c8_139, %c48_140] : memref<64x64xbf16, #tpu.memory_space<vmem>>, vector<8x16xbf16>
    tpu.vector_store %arg5[%c8_139, %c48_140], %76 {strides = array<i32>} : memref<64x64xbf16, #tpu.memory_space<vmem>>, vector<8x16xbf16>,
    %c0_141 = arith.constant 0 : index
    %c3_142 = arith.constant 3 : index
    %c1_143 = arith.constant 1 : index
    %c0_144 = arith.constant 0 : index
    %78 = vector.load %arg1[%c0_141, %c3_142, %c1_143, %c0_144] : memref<1x9x9x16xbf16, #tpu.memory_space<vmem>>, vector<1x1x8x16xbf16>
    %79 = vector.shape_cast %78 : vector<1x1x8x16xbf16> to vector<8x16xbf16>
    %c16_145 = arith.constant 16 : index
    %c48_146 = arith.constant 48 : index
    %80 = vector.load %arg5[%c16_145, %c48_146] : memref<64x64xbf16, #tpu.memory_space<vmem>>, vector<8x16xbf16>
    tpu.vector_store %arg5[%c16_145, %c48_146], %79 {strides = array<i32>} : memref<64x64xbf16, #tpu.memory_space<vmem>>, vector<8x16xbf16>,
    %c0_147 = arith.constant 0 : index
    %c4_148 = arith.constant 4 : index
    %c1_149 = arith.constant 1 : index
    %c0_150 = arith.constant 0 : index
    %81 = vector.load %arg1[%c0_147, %c4_148, %c1_149, %c0_150] : memref<1x9x9x16xbf16, #tpu.memory_space<vmem>>, vector<1x1x8x16xbf16>
    %82 = vector.shape_cast %81 : vector<1x1x8x16xbf16> to vector<8x16xbf16>
    %c24_151 = arith.constant 24 : index
    %c48_152 = arith.constant 48 : index
    %83 = vector.load %arg5[%c24_151, %c48_152] : memref<64x64xbf16, #tpu.memory_space<vmem>>, vector<8x16xbf16>
    tpu.vector_store %arg5[%c24_151, %c48_152], %82 {strides = array<i32>} : memref<64x64xbf16, #tpu.memory_space<vmem>>, vector<8x16xbf16>,
    %c0_153 = arith.constant 0 : index
    %c5_154 = arith.constant 5 : index
    %c1_155 = arith.constant 1 : index
    %c0_156 = arith.constant 0 : index
    %84 = vector.load %arg1[%c0_153, %c5_154, %c1_155, %c0_156] : memref<1x9x9x16xbf16, #tpu.memory_space<vmem>>, vector<1x1x8x16xbf16>
    %85 = vector.shape_cast %84 : vector<1x1x8x16xbf16> to vector<8x16xbf16>
    %c32_157 = arith.constant 32 : index
    %c48_158 = arith.constant 48 : index
    %86 = vector.load %arg5[%c32_157, %c48_158] : memref<64x64xbf16, #tpu.memory_space<vmem>>, vector<8x16xbf16>
    tpu.vector_store %arg5[%c32_157, %c48_158], %85 {strides = array<i32>} : memref<64x64xbf16, #tpu.memory_space<vmem>>, vector<8x16xbf16>,
    %c0_159 = arith.constant 0 : index
    %c6_160 = arith.constant 6 : index
    %c1_161 = arith.constant 1 : index
    %c0_162 = arith.constant 0 : index
    %87 = vector.load %arg1[%c0_159, %c6_160, %c1_161, %c0_162] : memref<1x9x9x16xbf16, #tpu.memory_space<vmem>>, vector<1x1x8x16xbf16>
    %88 = vector.shape_cast %87 : vector<1x1x8x16xbf16> to vector<8x16xbf16>
    %c40_163 = arith.constant 40 : index
    %c48_164 = arith.constant 48 : index
    %89 = vector.load %arg5[%c40_163, %c48_164] : memref<64x64xbf16, #tpu.memory_space<vmem>>, vector<8x16xbf16>
    tpu.vector_store %arg5[%c40_163, %c48_164], %88 {strides = array<i32>} : memref<64x64xbf16, #tpu.memory_space<vmem>>, vector<8x16xbf16>,
    %c0_165 = arith.constant 0 : index
    %c7_166 = arith.constant 7 : index
    %c1_167 = arith.constant 1 : index
    %c0_168 = arith.constant 0 : index
    %90 = vector.load %arg1[%c0_165, %c7_166, %c1_167, %c0_168] : memref<1x9x9x16xbf16, #tpu.memory_space<vmem>>, vector<1x1x8x16xbf16>
    %91 = vector.shape_cast %90 : vector<1x1x8x16xbf16> to vector<8x16xbf16>
    %c48_169 = arith.constant 48 : index
    %c48_170 = arith.constant 48 : index
    %92 = vector.load %arg5[%c48_169, %c48_170] : memref<64x64xbf16, #tpu.memory_space<vmem>>, vector<8x16xbf16>
    tpu.vector_store %arg5[%c48_169, %c48_170], %91 {strides = array<i32>} : memref<64x64xbf16, #tpu.memory_space<vmem>>, vector<8x16xbf16>,
    %c0_171 = arith.constant 0 : index
    %c8_172 = arith.constant 8 : index
    %c1_173 = arith.constant 1 : index
    %c0_174 = arith.constant 0 : index
    %93 = vector.load %arg1[%c0_171, %c8_172, %c1_173, %c0_174] : memref<1x9x9x16xbf16, #tpu.memory_space<vmem>>, vector<1x1x8x16xbf16>
    %94 = vector.shape_cast %93 : vector<1x1x8x16xbf16> to vector<8x16xbf16>
    %c56_175 = arith.constant 56 : index
    %c48_176 = arith.constant 48 : index
    %95 = vector.load %arg5[%c56_175, %c48_176] : memref<64x64xbf16, #tpu.memory_space<vmem>>, vector<8x16xbf16>
    tpu.vector_store %arg5[%c56_175, %c48_176], %94 {strides = array<i32>} : memref<64x64xbf16, #tpu.memory_space<vmem>>, vector<8x16xbf16>,
    %c0_177 = arith.constant 0 : index
    %c0_178 = arith.constant 0 : index
    %96 = vector.load %arg5[%c0_177, %c0_178] : memref<64x64xbf16, #tpu.memory_space<vmem>>, vector<64x64xbf16>
    %c0_179 = arith.constant 0 : index
    %c0_180 = arith.constant 0 : index
    %97 = vector.load %arg2[%c0_179, %c0_180] : memref<64x16xbf16, #tpu.memory_space<vmem>>, vector<64x16xbf16>
    %cst = arith.constant dense<0.000000e+00> : vector<64x16xf32>
    %98 = tpu.matmul %96, %97, %cst {dimension_numbers = #tpu.dot_dimension_numbers<[1], [0], [0], [1], [0, 0, 1, 1], [], []>} : vector<64x64xbf16>, vector<64x16xbf16>, vector<64x16xf32> -> vector<64x16xf32>
    %c0_181 = arith.constant 0 : index
    %c0_182 = arith.constant 0 : index
    %99 = vector.load %arg3[%c0_181, %c0_182] : memref<1x16xf32, #tpu.memory_space<vmem>>, vector<1x16xf32>
    %100 = vector.broadcast %99 : vector<1x16xf32> to vector<64x16xf32>
    %101 = arith.addf %98, %100 : vector<64x16xf32>
    %cst_183 = arith.constant 0.000000e+00 : f32
    %102 = vector.broadcast %cst_183 : f32 to vector<64x16xf32>
    %103 = arith.maximumf %101, %102 : vector<64x16xf32>
    %104 = arith.truncf %103 : vector<64x16xf32> to vector<64x16xbf16>
    %c0_184 = arith.constant 0 : index
    %c0_185 = arith.constant 0 : index
    %c0_186 = arith.constant 0 : index
    %105 = vector.load %arg4[%c0_184, %c0_185, %c0_186] : memref<1x64x16xbf16, #tpu.memory_space<vmem>>, vector<1x64x16xbf16>
    %106 = vector.shape_cast %105 : vector<1x64x16xbf16> to vector<64x16xbf16>
    %107 = vector.shape_cast %104 : vector<64x16xbf16> to vector<1x64x16xbf16>
    tpu.vector_store %arg4[%c0_184, %c0_185, %c0_186], %107 {strides = array<i32>} : memref<1x64x16xbf16, #tpu.memory_space<vmem>>, vector<1x64x16xbf16>,
    return
  }
  func.func @transform_0(%arg0: i32) -> (i32, i32, i32, i32) {
    %c0_i32 = arith.constant 0 : i32
    %c0_i32_0 = arith.constant 0 : i32
    %c0_i32_1 = arith.constant 0 : i32
    %c0_i32_2 = arith.constant 0 : i32
    return %arg0, %c0_i32, %c0_i32_0, %c0_i32_1 : i32, i32, i32, i32
  }
  func.func @transform_1(%arg0: i32) -> (i32, i32) {
    %c0_i32 = arith.constant 0 : i32
    %c0_i32_0 = arith.constant 0 : i32
    %c0_i32_1 = arith.constant 0 : i32
    return %c0_i32, %c0_i32_0 : i32, i32
  }
  func.func @transform_2(%arg0: i32) -> (i32, i32) {
    %c0_i32 = arith.constant 0 : i32
    %c0_i32_0 = arith.constant 0 : i32
    %c0_i32_1 = arith.constant 0 : i32
    return %c0_i32, %c0_i32_0 : i32, i32
  }
  func.func @transform_3(%arg0: i32) -> (i32, i32, i32) {
    %c0_i32 = arith.constant 0 : i32
    %c0_i32_0 = arith.constant 0 : i32
    %c0_i32_1 = arith.constant 0 : i32
    return %arg0, %c0_i32, %c0_i32_0 : i32, i32, i32
  }
}

module attributes {stable_mosaic.version = 11 : i64} {
  func.func @_conv2_head_kernel(%arg0: i32, %arg1: memref<1x5x5x64xbf16, #tpu.memory_space<vmem>>, %arg2: memref<256x32xbf16, #tpu.memory_space<vmem>>, %arg3: memref<1x32xf32, #tpu.memory_space<vmem>>, %arg4: memref<32x15xbf16, #tpu.memory_space<vmem>>, %arg5: memref<1x15xf32, #tpu.memory_space<vmem>>, %arg6: memref<1x16x15xf32, #tpu.memory_space<vmem>>, %arg7: memref<16x256xbf16, #tpu.memory_space<vmem>>) attributes {dimension_semantics = [#tpu.dimension_semantics<parallel>], iteration_bounds = array<i64: 2>, scalar_prefetch = 0 : i64, scratch_operands = 1 : i64, tpu.core_type = #tpu.core_type<tc>, window_params = [{transform_indices = @transform_0, window_bounds = array<i64: 1, 5, 5, 64>}, {pipeline_mode = #tpu.pipeline_mode<synchronous>, transform_indices = @transform_1, window_bounds = array<i64: 256, 32>}, {pipeline_mode = #tpu.pipeline_mode<synchronous>, transform_indices = @transform_2, window_bounds = array<i64: 1, 32>}, {pipeline_mode = #tpu.pipeline_mode<synchronous>, transform_indices = @transform_3, window_bounds = array<i64: 32, 15>}, {pipeline_mode = #tpu.pipeline_mode<synchronous>, transform_indices = @transform_4, window_bounds = array<i64: 1, 15>}, {transform_indices = @transform_5, window_bounds = array<i64: 1, 16, 15>}]} {
    %c0 = arith.constant 0 : index
    %c0_0 = arith.constant 0 : index
    %c0_1 = arith.constant 0 : index
    %c0_2 = arith.constant 0 : index
    %0 = vector.load %arg1[%c0, %c0_0, %c0_1, %c0_2] : memref<1x5x5x64xbf16, #tpu.memory_space<vmem>>, vector<1x1x4x64xbf16>
    %1 = vector.shape_cast %0 : vector<1x1x4x64xbf16> to vector<4x64xbf16>
    %c0_3 = arith.constant 0 : index
    %c0_4 = arith.constant 0 : index
    %2 = vector.load %arg7[%c0_3, %c0_4] : memref<16x256xbf16, #tpu.memory_space<vmem>>, vector<4x64xbf16>
    tpu.vector_store %arg7[%c0_3, %c0_4], %1 {strides = array<i32>} : memref<16x256xbf16, #tpu.memory_space<vmem>>, vector<4x64xbf16>,
    %c0_5 = arith.constant 0 : index
    %c1 = arith.constant 1 : index
    %c0_6 = arith.constant 0 : index
    %c0_7 = arith.constant 0 : index
    %3 = vector.load %arg1[%c0_5, %c1, %c0_6, %c0_7] : memref<1x5x5x64xbf16, #tpu.memory_space<vmem>>, vector<1x1x4x64xbf16>
    %4 = vector.shape_cast %3 : vector<1x1x4x64xbf16> to vector<4x64xbf16>
    %c4 = arith.constant 4 : index
    %c0_8 = arith.constant 0 : index
    %5 = vector.load %arg7[%c4, %c0_8] : memref<16x256xbf16, #tpu.memory_space<vmem>>, vector<4x64xbf16>
    tpu.vector_store %arg7[%c4, %c0_8], %4 {strides = array<i32>} : memref<16x256xbf16, #tpu.memory_space<vmem>>, vector<4x64xbf16>,
    %c0_9 = arith.constant 0 : index
    %c2 = arith.constant 2 : index
    %c0_10 = arith.constant 0 : index
    %c0_11 = arith.constant 0 : index
    %6 = vector.load %arg1[%c0_9, %c2, %c0_10, %c0_11] : memref<1x5x5x64xbf16, #tpu.memory_space<vmem>>, vector<1x1x4x64xbf16>
    %7 = vector.shape_cast %6 : vector<1x1x4x64xbf16> to vector<4x64xbf16>
    %c8 = arith.constant 8 : index
    %c0_12 = arith.constant 0 : index
    %8 = vector.load %arg7[%c8, %c0_12] : memref<16x256xbf16, #tpu.memory_space<vmem>>, vector<4x64xbf16>
    tpu.vector_store %arg7[%c8, %c0_12], %7 {strides = array<i32>} : memref<16x256xbf16, #tpu.memory_space<vmem>>, vector<4x64xbf16>,
    %c0_13 = arith.constant 0 : index
    %c3 = arith.constant 3 : index
    %c0_14 = arith.constant 0 : index
    %c0_15 = arith.constant 0 : index
    %9 = vector.load %arg1[%c0_13, %c3, %c0_14, %c0_15] : memref<1x5x5x64xbf16, #tpu.memory_space<vmem>>, vector<1x1x4x64xbf16>
    %10 = vector.shape_cast %9 : vector<1x1x4x64xbf16> to vector<4x64xbf16>
    %c12 = arith.constant 12 : index
    %c0_16 = arith.constant 0 : index
    %11 = vector.load %arg7[%c12, %c0_16] : memref<16x256xbf16, #tpu.memory_space<vmem>>, vector<4x64xbf16>
    tpu.vector_store %arg7[%c12, %c0_16], %10 {strides = array<i32>} : memref<16x256xbf16, #tpu.memory_space<vmem>>, vector<4x64xbf16>,
    %c0_17 = arith.constant 0 : index
    %c0_18 = arith.constant 0 : index
    %c1_19 = arith.constant 1 : index
    %c0_20 = arith.constant 0 : index
    %12 = vector.load %arg1[%c0_17, %c0_18, %c1_19, %c0_20] : memref<1x5x5x64xbf16, #tpu.memory_space<vmem>>, vector<1x1x4x64xbf16>
    %13 = vector.shape_cast %12 : vector<1x1x4x64xbf16> to vector<4x64xbf16>
    %c0_21 = arith.constant 0 : index
    %c64 = arith.constant 64 : index
    %14 = vector.load %arg7[%c0_21, %c64] : memref<16x256xbf16, #tpu.memory_space<vmem>>, vector<4x64xbf16>
    tpu.vector_store %arg7[%c0_21, %c64], %13 {strides = array<i32>} : memref<16x256xbf16, #tpu.memory_space<vmem>>, vector<4x64xbf16>,
    %c0_22 = arith.constant 0 : index
    %c1_23 = arith.constant 1 : index
    %c1_24 = arith.constant 1 : index
    %c0_25 = arith.constant 0 : index
    %15 = vector.load %arg1[%c0_22, %c1_23, %c1_24, %c0_25] : memref<1x5x5x64xbf16, #tpu.memory_space<vmem>>, vector<1x1x4x64xbf16>
    %16 = vector.shape_cast %15 : vector<1x1x4x64xbf16> to vector<4x64xbf16>
    %c4_26 = arith.constant 4 : index
    %c64_27 = arith.constant 64 : index
    %17 = vector.load %arg7[%c4_26, %c64_27] : memref<16x256xbf16, #tpu.memory_space<vmem>>, vector<4x64xbf16>
    tpu.vector_store %arg7[%c4_26, %c64_27], %16 {strides = array<i32>} : memref<16x256xbf16, #tpu.memory_space<vmem>>, vector<4x64xbf16>,
    %c0_28 = arith.constant 0 : index
    %c2_29 = arith.constant 2 : index
    %c1_30 = arith.constant 1 : index
    %c0_31 = arith.constant 0 : index
    %18 = vector.load %arg1[%c0_28, %c2_29, %c1_30, %c0_31] : memref<1x5x5x64xbf16, #tpu.memory_space<vmem>>, vector<1x1x4x64xbf16>
    %19 = vector.shape_cast %18 : vector<1x1x4x64xbf16> to vector<4x64xbf16>
    %c8_32 = arith.constant 8 : index
    %c64_33 = arith.constant 64 : index
    %20 = vector.load %arg7[%c8_32, %c64_33] : memref<16x256xbf16, #tpu.memory_space<vmem>>, vector<4x64xbf16>
    tpu.vector_store %arg7[%c8_32, %c64_33], %19 {strides = array<i32>} : memref<16x256xbf16, #tpu.memory_space<vmem>>, vector<4x64xbf16>,
    %c0_34 = arith.constant 0 : index
    %c3_35 = arith.constant 3 : index
    %c1_36 = arith.constant 1 : index
    %c0_37 = arith.constant 0 : index
    %21 = vector.load %arg1[%c0_34, %c3_35, %c1_36, %c0_37] : memref<1x5x5x64xbf16, #tpu.memory_space<vmem>>, vector<1x1x4x64xbf16>
    %22 = vector.shape_cast %21 : vector<1x1x4x64xbf16> to vector<4x64xbf16>
    %c12_38 = arith.constant 12 : index
    %c64_39 = arith.constant 64 : index
    %23 = vector.load %arg7[%c12_38, %c64_39] : memref<16x256xbf16, #tpu.memory_space<vmem>>, vector<4x64xbf16>
    tpu.vector_store %arg7[%c12_38, %c64_39], %22 {strides = array<i32>} : memref<16x256xbf16, #tpu.memory_space<vmem>>, vector<4x64xbf16>,
    %c0_40 = arith.constant 0 : index
    %c1_41 = arith.constant 1 : index
    %c0_42 = arith.constant 0 : index
    %c0_43 = arith.constant 0 : index
    %24 = vector.load %arg1[%c0_40, %c1_41, %c0_42, %c0_43] : memref<1x5x5x64xbf16, #tpu.memory_space<vmem>>, vector<1x1x4x64xbf16>
    %25 = vector.shape_cast %24 : vector<1x1x4x64xbf16> to vector<4x64xbf16>
    %c0_44 = arith.constant 0 : index
    %c128 = arith.constant 128 : index
    %26 = vector.load %arg7[%c0_44, %c128] : memref<16x256xbf16, #tpu.memory_space<vmem>>, vector<4x64xbf16>
    tpu.vector_store %arg7[%c0_44, %c128], %25 {strides = array<i32>} : memref<16x256xbf16, #tpu.memory_space<vmem>>, vector<4x64xbf16>,
    %c0_45 = arith.constant 0 : index
    %c2_46 = arith.constant 2 : index
    %c0_47 = arith.constant 0 : index
    %c0_48 = arith.constant 0 : index
    %27 = vector.load %arg1[%c0_45, %c2_46, %c0_47, %c0_48] : memref<1x5x5x64xbf16, #tpu.memory_space<vmem>>, vector<1x1x4x64xbf16>
    %28 = vector.shape_cast %27 : vector<1x1x4x64xbf16> to vector<4x64xbf16>
    %c4_49 = arith.constant 4 : index
    %c128_50 = arith.constant 128 : index
    %29 = vector.load %arg7[%c4_49, %c128_50] : memref<16x256xbf16, #tpu.memory_space<vmem>>, vector<4x64xbf16>
    tpu.vector_store %arg7[%c4_49, %c128_50], %28 {strides = array<i32>} : memref<16x256xbf16, #tpu.memory_space<vmem>>, vector<4x64xbf16>,
    %c0_51 = arith.constant 0 : index
    %c3_52 = arith.constant 3 : index
    %c0_53 = arith.constant 0 : index
    %c0_54 = arith.constant 0 : index
    %30 = vector.load %arg1[%c0_51, %c3_52, %c0_53, %c0_54] : memref<1x5x5x64xbf16, #tpu.memory_space<vmem>>, vector<1x1x4x64xbf16>
    %31 = vector.shape_cast %30 : vector<1x1x4x64xbf16> to vector<4x64xbf16>
    %c8_55 = arith.constant 8 : index
    %c128_56 = arith.constant 128 : index
    %32 = vector.load %arg7[%c8_55, %c128_56] : memref<16x256xbf16, #tpu.memory_space<vmem>>, vector<4x64xbf16>
    tpu.vector_store %arg7[%c8_55, %c128_56], %31 {strides = array<i32>} : memref<16x256xbf16, #tpu.memory_space<vmem>>, vector<4x64xbf16>,
    %c0_57 = arith.constant 0 : index
    %c4_58 = arith.constant 4 : index
    %c0_59 = arith.constant 0 : index
    %c0_60 = arith.constant 0 : index
    %33 = vector.load %arg1[%c0_57, %c4_58, %c0_59, %c0_60] : memref<1x5x5x64xbf16, #tpu.memory_space<vmem>>, vector<1x1x4x64xbf16>
    %34 = vector.shape_cast %33 : vector<1x1x4x64xbf16> to vector<4x64xbf16>
    %c12_61 = arith.constant 12 : index
    %c128_62 = arith.constant 128 : index
    %35 = vector.load %arg7[%c12_61, %c128_62] : memref<16x256xbf16, #tpu.memory_space<vmem>>, vector<4x64xbf16>
    tpu.vector_store %arg7[%c12_61, %c128_62], %34 {strides = array<i32>} : memref<16x256xbf16, #tpu.memory_space<vmem>>, vector<4x64xbf16>,
    %c0_63 = arith.constant 0 : index
    %c1_64 = arith.constant 1 : index
    %c1_65 = arith.constant 1 : index
    %c0_66 = arith.constant 0 : index
    %36 = vector.load %arg1[%c0_63, %c1_64, %c1_65, %c0_66] : memref<1x5x5x64xbf16, #tpu.memory_space<vmem>>, vector<1x1x4x64xbf16>
    %37 = vector.shape_cast %36 : vector<1x1x4x64xbf16> to vector<4x64xbf16>
    %c0_67 = arith.constant 0 : index
    %c192 = arith.constant 192 : index
    %38 = vector.load %arg7[%c0_67, %c192] : memref<16x256xbf16, #tpu.memory_space<vmem>>, vector<4x64xbf16>
    tpu.vector_store %arg7[%c0_67, %c192], %37 {strides = array<i32>} : memref<16x256xbf16, #tpu.memory_space<vmem>>, vector<4x64xbf16>,
    %c0_68 = arith.constant 0 : index
    %c2_69 = arith.constant 2 : index
    %c1_70 = arith.constant 1 : index
    %c0_71 = arith.constant 0 : index
    %39 = vector.load %arg1[%c0_68, %c2_69, %c1_70, %c0_71] : memref<1x5x5x64xbf16, #tpu.memory_space<vmem>>, vector<1x1x4x64xbf16>
    %40 = vector.shape_cast %39 : vector<1x1x4x64xbf16> to vector<4x64xbf16>
    %c4_72 = arith.constant 4 : index
    %c192_73 = arith.constant 192 : index
    %41 = vector.load %arg7[%c4_72, %c192_73] : memref<16x256xbf16, #tpu.memory_space<vmem>>, vector<4x64xbf16>
    tpu.vector_store %arg7[%c4_72, %c192_73], %40 {strides = array<i32>} : memref<16x256xbf16, #tpu.memory_space<vmem>>, vector<4x64xbf16>,
    %c0_74 = arith.constant 0 : index
    %c3_75 = arith.constant 3 : index
    %c1_76 = arith.constant 1 : index
    %c0_77 = arith.constant 0 : index
    %42 = vector.load %arg1[%c0_74, %c3_75, %c1_76, %c0_77] : memref<1x5x5x64xbf16, #tpu.memory_space<vmem>>, vector<1x1x4x64xbf16>
    %43 = vector.shape_cast %42 : vector<1x1x4x64xbf16> to vector<4x64xbf16>
    %c8_78 = arith.constant 8 : index
    %c192_79 = arith.constant 192 : index
    %44 = vector.load %arg7[%c8_78, %c192_79] : memref<16x256xbf16, #tpu.memory_space<vmem>>, vector<4x64xbf16>
    tpu.vector_store %arg7[%c8_78, %c192_79], %43 {strides = array<i32>} : memref<16x256xbf16, #tpu.memory_space<vmem>>, vector<4x64xbf16>,
    %c0_80 = arith.constant 0 : index
    %c4_81 = arith.constant 4 : index
    %c1_82 = arith.constant 1 : index
    %c0_83 = arith.constant 0 : index
    %45 = vector.load %arg1[%c0_80, %c4_81, %c1_82, %c0_83] : memref<1x5x5x64xbf16, #tpu.memory_space<vmem>>, vector<1x1x4x64xbf16>
    %46 = vector.shape_cast %45 : vector<1x1x4x64xbf16> to vector<4x64xbf16>
    %c12_84 = arith.constant 12 : index
    %c192_85 = arith.constant 192 : index
    %47 = vector.load %arg7[%c12_84, %c192_85] : memref<16x256xbf16, #tpu.memory_space<vmem>>, vector<4x64xbf16>
    tpu.vector_store %arg7[%c12_84, %c192_85], %46 {strides = array<i32>} : memref<16x256xbf16, #tpu.memory_space<vmem>>, vector<4x64xbf16>,
    %c0_86 = arith.constant 0 : index
    %c0_87 = arith.constant 0 : index
    %48 = vector.load %arg7[%c0_86, %c0_87] : memref<16x256xbf16, #tpu.memory_space<vmem>>, vector<16x256xbf16>
    %c0_88 = arith.constant 0 : index
    %c0_89 = arith.constant 0 : index
    %49 = vector.load %arg2[%c0_88, %c0_89] : memref<256x32xbf16, #tpu.memory_space<vmem>>, vector<256x32xbf16>
    %cst = arith.constant dense<0.000000e+00> : vector<16x32xf32>
    %50 = tpu.matmul %48, %49, %cst {dimension_numbers = #tpu.dot_dimension_numbers<[1], [0], [0], [1], [0, 0, 1, 1], [], []>} : vector<16x256xbf16>, vector<256x32xbf16>, vector<16x32xf32> -> vector<16x32xf32>
    %c0_90 = arith.constant 0 : index
    %c0_91 = arith.constant 0 : index
    %51 = vector.load %arg3[%c0_90, %c0_91] : memref<1x32xf32, #tpu.memory_space<vmem>>, vector<1x32xf32>
    %52 = vector.broadcast %51 : vector<1x32xf32> to vector<16x32xf32>
    %53 = arith.addf %50, %52 : vector<16x32xf32>
    %cst_92 = arith.constant 0.000000e+00 : f32
    %54 = vector.broadcast %cst_92 : f32 to vector<16x32xf32>
    %55 = arith.maximumf %53, %54 : vector<16x32xf32>
    %56 = arith.truncf %55 : vector<16x32xf32> to vector<16x32xbf16>
    %c0_93 = arith.constant 0 : index
    %c0_94 = arith.constant 0 : index
    %57 = vector.load %arg4[%c0_93, %c0_94] : memref<32x15xbf16, #tpu.memory_space<vmem>>, vector<32x15xbf16>
    %cst_95 = arith.constant dense<0.000000e+00> : vector<16x15xf32>
    %58 = tpu.matmul %56, %57, %cst_95 {dimension_numbers = #tpu.dot_dimension_numbers<[1], [0], [0], [1], [0, 0, 1, 1], [], []>} : vector<16x32xbf16>, vector<32x15xbf16>, vector<16x15xf32> -> vector<16x15xf32>
    %c0_96 = arith.constant 0 : index
    %c0_97 = arith.constant 0 : index
    %59 = vector.load %arg5[%c0_96, %c0_97] : memref<1x15xf32, #tpu.memory_space<vmem>>, vector<1x15xf32>
    %60 = vector.broadcast %59 : vector<1x15xf32> to vector<16x15xf32>
    %61 = arith.addf %58, %60 : vector<16x15xf32>
    %c0_98 = arith.constant 0 : index
    %c0_99 = arith.constant 0 : index
    %c0_100 = arith.constant 0 : index
    %62 = vector.load %arg6[%c0_98, %c0_99, %c0_100] : memref<1x16x15xf32, #tpu.memory_space<vmem>>, vector<1x16x15xf32>
    %63 = vector.shape_cast %62 : vector<1x16x15xf32> to vector<16x15xf32>
    %64 = vector.shape_cast %61 : vector<16x15xf32> to vector<1x16x15xf32>
    tpu.vector_store %arg6[%c0_98, %c0_99, %c0_100], %64 {strides = array<i32>} : memref<1x16x15xf32, #tpu.memory_space<vmem>>, vector<1x16x15xf32>,
    return
  }
  func.func @transform_0(%arg0: i32) -> (i32, i32, i32, i32) {
    %c0_i32 = arith.constant 0 : i32
    %c0_i32_0 = arith.constant 0 : i32
    %c0_i32_1 = arith.constant 0 : i32
    %c0_i32_2 = arith.constant 0 : i32
    return %arg0, %c0_i32, %c0_i32_0, %c0_i32_1 : i32, i32, i32, i32
  }
  func.func @transform_1(%arg0: i32) -> (i32, i32) {
    %c0_i32 = arith.constant 0 : i32
    %c0_i32_0 = arith.constant 0 : i32
    %c0_i32_1 = arith.constant 0 : i32
    return %c0_i32, %c0_i32_0 : i32, i32
  }
  func.func @transform_2(%arg0: i32) -> (i32, i32) {
    %c0_i32 = arith.constant 0 : i32
    %c0_i32_0 = arith.constant 0 : i32
    %c0_i32_1 = arith.constant 0 : i32
    return %c0_i32, %c0_i32_0 : i32, i32
  }
  func.func @transform_3(%arg0: i32) -> (i32, i32) {
    %c0_i32 = arith.constant 0 : i32
    %c0_i32_0 = arith.constant 0 : i32
    %c0_i32_1 = arith.constant 0 : i32
    return %c0_i32, %c0_i32_0 : i32, i32
  }
  func.func @transform_4(%arg0: i32) -> (i32, i32) {
    %c0_i32 = arith.constant 0 : i32
    %c0_i32_0 = arith.constant 0 : i32
    %c0_i32_1 = arith.constant 0 : i32
    return %c0_i32, %c0_i32_0 : i32, i32
  }
  func.func @transform_5(%arg0: i32) -> (i32, i32, i32) {
    %c0_i32 = arith.constant 0 : i32
    %c0_i32_0 = arith.constant 0 : i32
    %c0_i32_1 = arith.constant 0 : i32
    return %arg0, %c0_i32, %c0_i32_0 : i32, i32, i32
  }
}

</mosaic_0001>

<bundles_post_ra>
// kernel: forward.2
= control target key start
LH: loop header
LB: loop body
LE: loop exit
PB: predicated region body
PF: predicated region fallthrough
CT: control target
= control target key end

     0   :  { %s1020_s12 = smov 0   ;;  %s1160_s0 = inlined_call_operand.vmem [shape: bf16[2,9,9,16], index: 0, kind: input, shape index: {}]   ;;  %s1161_s1 = inlined_call_operand.vmem [shape: bf16[64,16], index: 1, kind: input, shape index: {}]   ;;  %s1162_s2 = inlined_call_operand.vmem [shape: f32[1,16], index: 2, kind: input, shape index: {}]   ;;  %s1163_s3 = inlined_call_operand.vmem [shape: bf16[2,64,16], index: 3, kind: output, shape index: {}]  }
   0x1 LB: > { %s804_s13 = sadd.s32 4294967295, %s995_s12   ;;  %p808_p0 = scmp.ge.s32.totalorder %s995_s12, 1  ;;  %s995_s12 = sphi %s1020_s12, %s13_s12  }
   0x2   : > { %p137_p1 = scmp.lt.s32.totalorder %s995_s12, 3 }
   0x4   : > { %p138_p2 = pnand %p808_p0, %p137_p1 }
   0x5   : > { %p161_p3 = scmp.lt.s32.totalorder (!%p138_p2), %s804_s13, 1  ;;  %s997_s18 = smov (!%p138_p2), 32   ;;  %vm173_vm0 = vcmask (!%p138_p2), 125952   ;;  %vm181_vm1 = vcmask (!%p138_p2), 130052   ;;  %v985_v56 = vld [vmem:[%s1161_s1] sm:$0xff] (!%p138_p2)   ;;  %v986_v63 = vld [vmem:[%s1161_s1 + $0x8] sm:$0xff] (!%p138_p2)  }
   0x6   : > { %141 = sbr.rel (%p138_p2) target bundleno = 410 (0x19a), region = 32  ;;  %s998_s19 = smov (!%p138_p2), 16   ;;  %921 = vmatprep.subr.bf16.mxu0 (!%p138_p2), %v985_v56  ;;  %937 = vmatprep.subr.bf16.mxu1 (!%p138_p2), %v985_v56  ;;  %vm230_vm2 = vcmask (!%p138_p2), 257152   ;;  %vm370_vm3 = vcmask (!%p138_p2), 388352   ;;  %vm250_vm4 = vcmask (!%p138_p2), 261252   ;;  %vm379_vm5 = vcmask (!%p138_p2), 392452  }
   0x7   : > { %922 = vmatpush3.bf16.msra.mxu0 (!%p138_p2), %v985_v56  ;;  %941 = vmatpush3.bf16.msra.mxu1 (!%p138_p2), %v985_v56  ;;  %s999_s28 = smov (!%p138_p2), 48   ;;  %vm467_vm6 = vcmask (!%p138_p2), 523652   ;;  %vm447_vm7 = vcmask (!%p138_p2), 519552   ;;  %vm623_vm8 = vcmask (!%p138_p2), 523264  }
   0x8   : > { %923 = vmatprep.subr.bf16.mxu0 (!%p138_p2), %v986_v63  ;;  %938 = vmatprep.subr.bf16.mxu1 (!%p138_p2), %v986_v63 }
   0xb   : > { %924 = vmatpush3.bf16.msra.mxu0 (!%p138_p2), %v986_v63  ;;  %942 = vmatpush3.bf16.msra.mxu1 (!%p138_p2), %v986_v63 }
   0xd   : > { %s1165_s13 = smov (!%p161_p3, %s804_s13), 1 }
   0xe   : > { %s945_s14 = smul.u32 72, %s1165_s13  ;;  %s904_s4 = sshll.u32 %s1165_s13, 5 }
   0xf   : > { %s1139_s7 = scalar_lea.vmem %s1163_s3, %s904_s4 }
  0x10   : > { %s1034_s17 = scalar_lea.vmem %s1160_s0, %s945_s14 }
  0x11   : > { %v957_v0 = vld [vmem:[%s1034_s17 + $0x10] ss:$0 sps:$4 sm:$0xff]   ;;  %v958_v1 = vld [vmem:[%s1034_s17 + $0x8] ss:$0 sps:$4 sm:$0xff]   ;;  %v959_v2 = vld [vmem:[%s1034_s17 + $0x20] sm:$0x1f]  }
  0x12   : > { %376 = vrot.lane.b32.xlu1 %v957_v0, %s997_s18  ;;  %367 = vrot.lane.b32.xlu0 %v958_v1, %s997_s18  ;;  %v960_v3 = vld [vmem:[%s1034_s17] sm:$0x1f]   ;;  %v297_v4 = vshrl.u32 %v959_v2, 16  ;;  %v299_v5 = vshll.u32 %v959_v2, 16  ;;  %v961_v6 = vld [vmem:[%s1034_s17 + $0x28] sm:$0x1f]  }
  0x13   : > { %v221_v7 = vshrl.u32 %v960_v3, 16  ;;  %v223_v8 = vshll.u32 %v960_v3, 16  ;;  %v962_v9 = vld [vmem:[%s1034_s17 + $0x8] sm:$0x1f]   ;;  %v315_v11 = vshrl.u32 %v961_v6, 16  ;;  %v318_v12 = vshll.u32 %v961_v6, 16 }
  0x14   : > { %v301_v10 = vrot.slane %v299_v5, 1  ;;  %v240_v14 = vshrl.u32 %v962_v9, 16  ;;  %v243_v15 = vshll.u32 %v962_v9, 16  ;;  %v963_v19 = vld [vmem:[%s1034_s17 + $0x18] sm:$0x1f]  }
  0x15   : > { %v225_v13 = vrot.slane %v223_v8, 1  ;;  %v317_v17 = vrot.slane %v315_v11, 4  ;;  %v320_v18 = vrot.slane %v318_v12, 5  ;;  %v964_v23 = vld [vmem:[%s1034_s17 + $0x10] sm:$0x1f]   ;;  %v278_v25 = vshrl.u32 %v963_v19, 16 }
  0x16   : > { %v302_v16 = vor.u32 %v301_v10, %v297_v4  ;;  %v242_v21 = vrot.slane %v240_v14, 4  ;;  %v245_v22 = vrot.slane %v243_v15, 5  ;;  %v281_v26 = vshll.u32 %v963_v19, 16  ;;  %v965_v30 = vld [vmem:[%s1034_s17 + $0x38] sm:$0x1f]  }
  0x17   : > { %v226_v20 = vor.u32 %v225_v13, %v221_v7  ;;  %v321_v24 = vor.u32 %v320_v18, %v317_v17  ;;  %v260_v28 = vshrl.u32 %v964_v23, 16  ;;  %v262_v29 = vshll.u32 %v964_v23, 16  ;;  %v966_v33 = vld [vmem:[%s1034_s17 + $0x30] sm:$0x1f]   ;;  %v974_v48 = vld [vmem:[%s1034_s17 + $0x8] sm:$0x1f]  }
  0x18   : > { %303 = vrot.lane.b32.xlu1 %v302_v16, %s998_s19  ;;  %v246_v27 = vor.u32 %v245_v22, %v242_v21  ;;  %v280_v31 = vrot.slane %v278_v25, 4  ;;  %v283_v32 = vrot.slane %v281_v26, 5  ;;  %v352_v35 = vshrl.u32 %v965_v30, 16  ;;  %v967_v46 = vld [vmem:[%s1034_s17 + $0x30] ss:$0 sps:$4 sm:$0xff]   ;;  %v988_v26 = vld [vmem:[%s1161_s1 + $0x18] sm:$0xff]  }
  0x19   : > { %227 = vrot.lane.b32.xlu0 %v226_v20, %s998_s19  ;;  %v264_v34 = vrot.slane %v262_v29, 1  ;;  %v355_v36 = vshll.u32 %v965_v30, 16  ;;  %v336_v38 = vshll.u32 %v966_v33, 16  ;;  %v334_v42 = vshrl.u32 %v966_v33, 16  ;;  %v973_v47 = vld [vmem:[%s1034_s17 + $0x10] sm:$0x1f]  }
  0x1a   : > { %v284_v37 = vor.u32 %v283_v32, %v280_v31  ;;  %v354_v40 = vrot.slane %v352_v35, 4  ;;  %v975_v49 = vld [vmem:[%s1034_s17 + $0x30] sm:$0x1f]   ;;  %v968_v50 = vld [vmem:[%s1034_s17 + $0x28] ss:$0 sps:$4 sm:$0xff]   ;;  %v457_v53 = vshrl.u32 %v973_v47, 16 }
  0x1b   : > { %v265_v39 = vor.u32 %v264_v34, %v260_v28  ;;  %v357_v41 = vrot.slane %v355_v36, 5  ;;  %v338_v43 = vrot.slane %v336_v38, 1  ;;  %v1062_v51 = vld [vmem:[%s1034_s17 + $0x28] sm:$0x1f]   ;;  %v969_v52 = vld [vmem:[%s1034_s17 + $0x20] ss:$0 sps:$4 sm:$0xff]  }
  0x1c   : > { %322 = vrot.lane.b32.xlu1 %v321_v24, %s998_s19  ;;  %v460_v54 = vshll.u32 %v973_v47, 16  ;;  %v440_v55 = vshll.u32 %v974_v48, 16  ;;  %v532_v57 = vshrl.u32 %v975_v49, 16  ;;  %v535_v58 = vshll.u32 %v975_v49, 16  ;;  %v970_v59 = vld [vmem:[%s1034_s17 + $0x18] ss:$0 sps:$4 sm:$0xff]  }
  0x1d   : > { %247 = vrot.lane.b32.xlu0 %v246_v27, %s998_s19  ;;  %v358_v44 = vor.u32 %v357_v41, %v354_v40  ;;  %v339_v45 = vor.u32 %v338_v43, %v334_v42  ;;  %v977_v60 = vld [vmem:[%s1034_s17 + $0x20] sm:$0x1f]   ;;  %v516_v62 = vshll.u32 %v1062_v51, 16  ;;  %v972_v0 = vld [vmem:[%s1034_s17 + $0x38] ss:$0 sps:$4 sm:$0xff]   ;;  %v459_v1 = vrot.slane %v457_v53, 4 }
  0x1e   : > { %v971_v61 = vld [vmem:[%s1034_s17 + $0x40] ss:$0 sps:$4 sm:$0xff]   ;;  %v462_v2 = vrot.slane %v460_v54, 5  ;;  %v438_v3 = vshrl.u32 %v974_v48, 16  ;;  %v442_v4 = vrot.slane %v440_v55, 1  ;;  %v534_v5 = vrot.slane %v532_v57, 4 }
  0x1f   : > { %v537_v6 = vrot.slane %v535_v58, 5  ;;  %v978_v7 = vld [vmem:[%s1034_s17 + $0x18] sm:$0x1f]   ;;  %v514_v8 = vshrl.u32 %v1062_v51, 16  ;;  %v495_v9 = vshrl.u32 %v977_v60, 16  ;;  %v518_v12 = vrot.slane %v516_v62, 1 }
  0x20   : > { %285 = vrot.lane.b32.xlu1 %v284_v37, %s998_s19  ;;  %v817_v10 = vld [vmem:[%s1034_s17 + $0x20] sm:$0xf]  ;;  %v498_v13 = vshll.u32 %v977_v60, 16  ;;  %v980_v15 = vld [vmem:[%s1034_s17 + $0x38] sm:$0x1f]   ;;  %v463_v18 = vor.u32 %v462_v2, %v459_v1  ;;  %v479_v19 = vshll.u32 %v978_v7, 16  ;;  %v443_v22 = vor.u32 %v442_v4, %v438_v3 }
  0x21   : > { %266 = vrot.lane.b32.xlu0 %v265_v39, %s998_s19  ;;  %v172_v11 = vld [vmem:[%s1034_s17] sm:$0xf]  ;;  %195 = vst.msk [vmem:[#allocation2 + $0x10] sm:$0xf] %vm173_vm0, %v817_v10  ;;  %v981_v16 = vld [vmem:[%s1034_s17 + $0x28] ss:$0 sps:$4 sm:$0xff]   ;;  %v538_v27 = vor.u32 %v537_v6, %v534_v5  ;;  %v519_v32 = vor.u32 %v518_v12, %v514_v8 }
  0x22   : > { %v979_v14 = vld [vmem:[%s1034_s17 + $0x40] sm:$0x1f]   ;;  %174 = vst.msk [vmem:[#allocation2] sm:$0xf] %vm173_vm0, %v172_v11  ;;  %v982_v17 = vld [vmem:[%s1034_s17 + $0x8] ss:$0 sps:$4 sm:$0xff]  }
  0x23   : > { %v983_v20 = vld [vmem:[%s1034_s17 + $0x18] ss:$0 sps:$4 sm:$0xff]   ;;  %v987_v21 = vld [vmem:[%s1161_s1 + $0x10] sm:$0xff]   ;;  %202 = vst.msk [vmem:[#allocation2 + $0x10] sm:$0xf0] %vm181_vm1, %v981_v16  ;;  %v497_v28 = vrot.slane %v495_v9, 4 }
  0x24   : > { %359 = vrot.lane.b32.xlu1 %v358_v44, %s998_s19  ;;  %182 = vst.msk [vmem:[#allocation2] sm:$0xf0] %vm181_vm1, %v982_v17  ;;  %v814_v23 = vld [vmem:[%s1034_s17 + $0x10] sm:$0xf]  ;;  %v984_v24 = vld [vmem:[%s1034_s17 + $0x38] ss:$0 sps:$4 sm:$0xff]   ;;  %925 = vmatprep.subr.bf16.mxu0 %v987_v21 }
  0x25   : > { %340 = vrot.lane.b32.xlu0 %v339_v45, %s998_s19  ;;  %192 = vst.msk [vmem:[#allocation2 + $0x8] sm:$0xf0] %vm181_vm1, %v983_v20  ;;  %v820_v25 = vld [vmem:[%s1034_s17 + $0x30] sm:$0xf]  ;;  %939 = vmatprep.subr.bf16.mxu1 %v987_v21  ;;  %212 = vst.msk [vmem:[#allocation2 + $0x18] sm:$0xf0] %vm181_vm1, %v984_v24 }
  0x26   : > { %185 = vst.msk [vmem:[#allocation2 + $0x8] sm:$0xf] %vm173_vm0, %v814_v23  ;;  %205 = vst.msk [vmem:[#allocation2 + $0x18] sm:$0xf] %vm173_vm0, %v820_v25  ;;  %926 = vmatpush3.bf16.msra.mxu0 %v987_v21  ;;  %943 = vmatpush3.bf16.msra.mxu1 %v987_v21  ;;  %v500_v29 = vrot.slane %v498_v13, 5  ;;  %v569_v30 = vshrl.u32 %v979_v14, 16 }
  0x27   : > { %v572_v31 = vshll.u32 %v979_v14, 16  ;;  %927 = vmatprep.subr.bf16.mxu0 %v988_v26  ;;  %v477_v33 = vshrl.u32 %v978_v7, 16  ;;  %v481_v34 = vrot.slane %v479_v19, 1  ;;  %v553_v35 = vshll.u32 %v980_v15, 16  ;;  %940 = vmatprep.subr.bf16.mxu1 %v988_v26  ;;  %v885_v8 = vld [vmem:[%s1162_s2] ss:$0 sm:$0xff] }
  0x28   : > { %409 = vrot.lane.b32.xlu1 %v967_v46, %s997_s18  ;;  %v501_v36 = vor.u32 %v500_v29, %v497_v28  ;;  %v571_v37 = vrot.slane %v569_v30, 4  ;;  %v551_v40 = vshrl.u32 %v980_v15, 16 }
  0x29   : > { %401 = vrot.lane.b32.xlu0 %v968_v50, %s997_s18  ;;  %v574_v38 = vrot.slane %v572_v31, 5  ;;  %v482_v39 = vor.u32 %v481_v34, %v477_v33  ;;  %v555_v41 = vrot.slane %v553_v35, 1 }
  0x2a   : > { %928 = vmatpush3.bf16.msra.mxu0 %v988_v26  ;;  %944 = vmatpush3.bf16.msra.mxu1 %v988_v26 }
  0x2b   : > { %v575_v42 = vor.u32 %v574_v38, %v571_v37  ;;  %v556_v43 = vor.u32 %v555_v41, %v551_v40 }
  0x2c   : > { %393 = vrot.lane.b32.xlu1 %v969_v52, %s997_s18 }
  0x2d   : > { %385 = vrot.lane.b32.xlu0 %v970_v59, %s997_s18 }
  0x30   : > { %426 = vrot.lane.b32.xlu1 %v971_v61, %s997_s18 }
  0x31   : > { %417 = vrot.lane.b32.xlu0 %v972_v0, %s997_s18 }
  0x34   : > { %464 = vrot.lane.b32.xlu1 %v463_v18, %s999_s28 }
  0x35   : > { %444 = vrot.lane.b32.xlu0 %v443_v22, %s999_s28 }
  0x38   : > { %539 = vrot.lane.b32.xlu1 %v538_v27, %s999_s28 }
  0x39   : > { %520 = vrot.lane.b32.xlu0 %v519_v32, %s999_s28 }
  0x3c   : > { %502 = vrot.lane.b32.xlu1 %v501_v36, %s999_s28 }
  0x3d   : > { %483 = vrot.lane.b32.xlu0 %v482_v39, %s999_s28 }
  0x40   : > { %576 = vrot.lane.b32.xlu1 %v575_v42, %s999_s28 }
  0x41   : > { %557 = vrot.lane.b32.xlu0 %v556_v43, %s999_s28 }
  0x84   : > { %v377_v44 = vpop.permute.xlu1 %376  ;;  %v368_v45 = vpop.permute.xlu0 %367 }
  0x8a   : > { %v304_v46 = vpop.permute.xlu1 %303 }
  0x8b   : > { %306 = vst.msk [vmem:[#allocation2 + $0x10] sm:$0xf] %vm230_vm2, %v304_v46  ;;  %v228_v47 = vpop.permute.xlu0 %227 }
  0x8c   : > { %231 = vst.msk [vmem:[#allocation2] sm:$0xf] %vm230_vm2, %v228_v47 }
  0x8d   : > { %371 = vst.msk [vmem:[#allocation2] sm:$0xf] %vm370_vm3, %v368_v45 }
  0x8e   : > { %v323_v48 = vpop.permute.xlu1 %322 }
  0x8f   : > { %325 = vst.msk [vmem:[#allocation2 + $0x10] sm:$0xf0] %vm250_vm4, %v323_v48  ;;  %v248_v49 = vpop.permute.xlu0 %247 }
  0x90   : > { %251 = vst.msk [vmem:[#allocation2] sm:$0xf0] %vm250_vm4, %v248_v49 }
  0x91   : > { %380 = vst.msk [vmem:[#allocation2] sm:$0xf0] %vm379_vm5, %v377_v44 }
  0x92   : > { %v286_v50 = vpop.permute.xlu1 %285 }
  0x93   : > { %288 = vst.msk [vmem:[#allocation2 + $0x8] sm:$0xf0] %vm250_vm4, %v286_v50  ;;  %v267_v51 = vpop.permute.xlu0 %266 }
  0x94   : > { %269 = vst.msk [vmem:[#allocation2 + $0x8] sm:$0xf] %vm230_vm2, %v267_v51 }
  0x96   : > { %v360_v52 = vpop.permute.xlu1 %359 }
  0x97   : > { %362 = vst.msk [vmem:[#allocation2 + $0x18] sm:$0xf0] %vm250_vm4, %v360_v52  ;;  %v341_v53 = vpop.permute.xlu0 %340 }
  0x98   : > { %343 = vst.msk [vmem:[#allocation2 + $0x18] sm:$0xf] %vm230_vm2, %v341_v53 }
  0x9a   : > { %v410_v54 = vpop.permute.xlu1 %409 }
  0x9b   : > { %412 = vst.msk [vmem:[#allocation2 + $0x10] sm:$0xf0] %vm379_vm5, %v410_v54  ;;  %v402_v55 = vpop.permute.xlu0 %401 }
  0x9c   : > { %404 = vst.msk [vmem:[#allocation2 + $0x10] sm:$0xf] %vm370_vm3, %v402_v55 }
  0x9e   : > { %v394_v56 = vpop.permute.xlu1 %393 }
  0x9f   : > { %396 = vst.msk [vmem:[#allocation2 + $0x8] sm:$0xf0] %vm379_vm5, %v394_v56  ;;  %v386_v57 = vpop.permute.xlu0 %385 }
  0xa0   : > { %388 = vst.msk [vmem:[#allocation2 + $0x8] sm:$0xf] %vm370_vm3, %v386_v57 }
  0xa2   : > { %v427_v58 = vpop.permute.xlu1 %426 }
  0xa3   : > { %429 = vst.msk [vmem:[#allocation2 + $0x18] sm:$0xf0] %vm379_vm5, %v427_v58  ;;  %v418_v59 = vpop.permute.xlu0 %417 }
  0xa4   : > { %420 = vst.msk [vmem:[#allocation2 + $0x18] sm:$0xf] %vm370_vm3, %v418_v59 }
  0xa6   : > { %v465_v60 = vpop.permute.xlu1 %464 }
  0xa7   : > { %468 = vst.msk [vmem:[#allocation2] sm:$0xf0] %vm467_vm6, %v465_v60  ;;  %v445_v61 = vpop.permute.xlu0 %444 }
  0xa8   : > { %448 = vst.msk [vmem:[#allocation2] sm:$0xf] %vm447_vm7, %v445_v61 }
  0xaa   : > { %v540_v62 = vpop.permute.xlu1 %539 }
  0xab   : > { %542 = vst.msk [vmem:[#allocation2 + $0x10] sm:$0xf0] %vm467_vm6, %v540_v62  ;;  %v521_v63 = vpop.permute.xlu0 %520 }
  0xac   : > { %523 = vst.msk [vmem:[#allocation2 + $0x10] sm:$0xf] %vm447_vm7, %v521_v63 }
  0xae   : > { %v503_v0 = vpop.permute.xlu1 %502 }
  0xaf   : > { %505 = vst.msk [vmem:[#allocation2 + $0x8] sm:$0xf0] %vm467_vm6, %v503_v0  ;;  %v484_v1 = vpop.permute.xlu0 %483  ;;  %v580_v2 = vld [vmem:[#allocation2] sm:$0xff] }
  0xb0   : > { %486 = vst.msk [vmem:[#allocation2 + $0x8] sm:$0xf] %vm447_vm7, %v484_v1  ;;  %929 = vmatprep.mubr.msk.bf16.mxu0 %vm623_vm8, %v580_v2 }
  0xb2   : > { %v577_v3 = vpop.permute.xlu1 %576 }
  0xb3   : > { %579 = vst.msk [vmem:[#allocation2 + $0x18] sm:$0xf0] %vm467_vm6, %v577_v3  ;;  %v558_v4 = vpop.permute.xlu0 %557  ;;  %v582_v5 = vld [vmem:[#allocation2 + $0x10] sm:$0xff] }
  0xb4   : > { %560 = vst.msk [vmem:[#allocation2 + $0x18] sm:$0xf] %vm447_vm7, %v558_v4  ;;  %933 = vmatprep.mubr.msk.bf16.mxu1 %vm623_vm8, %v582_v5 }
  0xb7   : > { %v581_v6 = vld [vmem:[#allocation2 + $0x8] sm:$0xff] }
  0xb8   : > { %930 = vmatmul.mubr.msk.bf16.vlgmr.msra.gmra.mrb[0].mxu0 %vm623_vm8, %v581_v6 }
  0xbb   : > { %v583_v7 = vld [vmem:[#allocation2 + $0x18] sm:$0xff] }
  0xbc   : > { %934 = vmatmul.mubr.msk.bf16.vlgmr.msra.gmra.mrb[0].mxu1 %vm623_vm8, %v583_v7 }
 0x18b   : > { %v931_v9 = vpop.f32.mrb[0].mxu0 }
 0x18c   : > { %v679_v10 = vadd.f32 %v931_v9, %v885_v8  ;;  %v670_v11 = vpop.f32.mrb[1].mxu0 }
 0x18d   : > { %v671_v12 = vadd.f32 %v885_v8, %v670_v11  ;;  %v932_v13 = vpop.f32.mrb[2].mxu0 }
 0x18e   : > { %v703_v14 = vmax.f32 %v679_v10, 0.0  ;;  %v682_v15 = vadd.f32 %v932_v13, %v885_v8  ;;  %v673_v16 = vpop.f32.mrb[3].mxu0 }
 0x18f   : > { %v701_v17 = vmax.f32 %v671_v12, 0.0  ;;  %v674_v18 = vadd.f32 %v885_v8, %v673_v16  ;;  %v935_v19 = vpop.f32.mrb[0].mxu1 }
 0x190   : > { %v907_v20 = vpack.c.bf16 %v703_v14, %v703_v14  ;;  %v704_v21 = vmax.f32 %v682_v15, 0.0  ;;  %v695_v22 = vadd.f32 %v935_v19, %v885_v8  ;;  %v686_v23 = vpop.f32.mrb[1].mxu1 }
 0x191   : > { %v905_v24 = vpack.c.bf16 %v701_v17, %v701_v17  ;;  %v702_v25 = vmax.f32 %v674_v18, 0.0  ;;  %v687_v26 = vadd.f32 %v885_v8, %v686_v23  ;;  %v936_v27 = vpop.f32.mrb[2].mxu1 }
 0x192   : > { %743 = vst.msk [vmem:[%s1139_s7 + $0x8] sm:$0xf] %vm173_vm0, %v907_v20  ;;  %v908_v28 = vpack.c.bf16 %v704_v21, %v704_v21  ;;  %v707_v29 = vmax.f32 %v695_v22, 0.0  ;;  %v698_v30 = vadd.f32 %v936_v27, %v885_v8  ;;  %v689_v31 = vpop.f32.mrb[3].mxu1 }
 0x193   : > { %741 = vst.msk [vmem:[%s1139_s7] sm:$0xf] %vm173_vm0, %v905_v24  ;;  %v906_v32 = vpack.c.bf16 %v702_v25, %v702_v25  ;;  %v705_v33 = vmax.f32 %v687_v26, 0.0  ;;  %v690_v34 = vadd.f32 %v885_v8, %v689_v31 }
 0x194   : > { %744 = vst.msk [vmem:[%s1139_s7 + $0xc] sm:$0xf] %vm173_vm0, %v908_v28  ;;  %v911_v35 = vpack.c.bf16 %v707_v29, %v707_v29  ;;  %v708_v36 = vmax.f32 %v698_v30, 0.0 }
 0x195   : > { %742 = vst.msk [vmem:[%s1139_s7 + $0x4] sm:$0xf] %vm173_vm0, %v906_v32  ;;  %v909_v37 = vpack.c.bf16 %v705_v33, %v705_v33  ;;  %v706_v38 = vmax.f32 %v690_v34, 0.0 }
 0x196   : > { %747 = vst.msk [vmem:[%s1139_s7 + $0x18] sm:$0xf] %vm173_vm0, %v911_v35  ;;  %v912_v39 = vpack.c.bf16 %v708_v36, %v708_v36 }
 0x197   : > { %745 = vst.msk [vmem:[%s1139_s7 + $0x10] sm:$0xf] %vm173_vm0, %v909_v37  ;;  %v910_v40 = vpack.c.bf16 %v706_v38, %v706_v38 }
 0x198   : > { %748 = vst.msk [vmem:[%s1139_s7 + $0x1c] sm:$0xf] %vm173_vm0, %v912_v39 }
 0x199   : > { %746 = vst.msk [vmem:[%s1139_s7 + $0x14] sm:$0xf] %vm173_vm0, %v910_v40 }
 0x19a PF: > { %s13_s12 = sadd.s32 1, %s995_s12  }
 0x19b   : > { %p10_p4 = scmp.ge.s32.totalorder %s13_s12, 4  }
 0x19d   :  { %12 = sbr.rel (!%p10_p4) target bundleno = 1 (0x1), region = 70 }

// kernel: forward.3
= control target key start
LH: loop header
LB: loop body
LE: loop exit
PB: predicated region body
PF: predicated region fallthrough
CT: control target
= control target key end

     0   :  { %s893_s18 = smov 0   ;;  %s1010_s0 = inlined_call_operand.vmem [shape: bf16[2,5,5,64], index: 0, kind: input, shape index: {}]   ;;  %s1011_s1 = inlined_call_operand.vmem [shape: bf16[256,32], index: 1, kind: input, shape index: {}]   ;;  %s1012_s2 = inlined_call_operand.vmem [shape: f32[1,32], index: 2, kind: input, shape index: {}]   ;;  %s1013_s3 = inlined_call_operand.vmem [shape: bf16[32,15], index: 3, kind: input, shape index: {}]   ;;  %s1014_s4 = inlined_call_operand.vmem [shape: f32[1,15], index: 4, kind: input, shape index: {}]   ;;  %s1015_s5 = inlined_call_operand.vmem [shape: f32[2,16,15], index: 5, kind: output, shape index: {}]  }
   0x1 LB: > { %s715_s19 = sadd.s32 4294967295, %s858_s18   ;;  %p719_p0 = scmp.ge.s32.totalorder %s858_s18, 1  ;;  %s858_s18 = sphi %s893_s18, %s15_s18  }
   0x2   : > { %p187_p1 = scmp.lt.s32.totalorder %s858_s18, 3 }
   0x4   : > { %p188_p2 = pnand %p719_p0, %p187_p1 }
   0x5   : > { %p215_p3 = scmp.lt.s32.totalorder (!%p188_p2), %s715_s19, 1  ;;  %v828_v0 = vld [vmem:[%s1011_s1 + $0x40] sm:$0xff] (!%p188_p2)   ;;  %v830_v2 = vld [vmem:[%s1011_s1 + $0x48] sm:$0xff] (!%p188_p2)   ;;  %v832_v4 = vld [vmem:[%s1011_s1 + $0x50] sm:$0xff] (!%p188_p2)   ;;  %vm244_vm0 = vcmask (!%p188_p2), 521220   ;;  %vm227_vm1 = vcmask (!%p188_p2), 517120  }
   0x6   : > { %191 = sbr.rel (%p188_p2) target bundleno = 600 (0x258), region = 40  ;;  %v829_v1 = vld [vmem:[%s1011_s1] sm:$0xff] (!%p188_p2)   ;;  %775 = vmatprep.subr.bf16.mxu0 (!%p188_p2), %v828_v0  ;;  %v831_v3 = vld [vmem:[%s1011_s1 + $0x8] sm:$0xff] (!%p188_p2)   ;;  %v833_v6 = vld [vmem:[%s1011_s1 + $0x10] sm:$0xff] (!%p188_p2)   ;;  %s860_s15 = smov (!%p188_p2), 64   ;;  %vm253_vm2 = vcmask (!%p188_p2), 523270  }
   0x7   : > { %776 = vmatpush3.bf16.msra.mxu0 (!%p188_p2), %v829_v1  ;;  %v835_v8 = vld [vmem:[%s1011_s1 + $0x58] sm:$0xff] (!%p188_p2)   ;;  %v839_v39 = vld [vmem:[%s1011_s1 + $0x60] sm:$0xff] (!%p188_p2)   ;;  %v842_v53 = vld [vmem:[%s1011_s1 + $0x68] sm:$0xff] (!%p188_p2)   ;;  %vm236_vm3 = vcmask (!%p188_p2), 519170   ;;  %vm303_vm4 = vcmask (!%p188_p2), 1046020   ;;  %vm269_vm5 = vcmask (!%p188_p2), 1041920  }
   0x8   : > { %777 = vmatprep.subr.bf16.mxu0 (!%p188_p2), %v830_v2  ;;  %v836_v20 = vld [vmem:[%s1011_s1 + $0x18] sm:$0xff] (!%p188_p2)   ;;  %v840_v48 = vld [vmem:[%s1011_s1 + $0x20] sm:$0xff] (!%p188_p2)   ;;  %v843_v58 = vld [vmem:[%s1011_s1 + $0x28] sm:$0xff] (!%p188_p2)   ;;  %vm320_vm6 = vcmask (!%p188_p2), 1048070   ;;  %vm286_vm7 = vcmask (!%p188_p2), 1043970   ;;  %vm862_vm8 = vmmov (!%p188_p2), 0  }
   0x9   : > { %v846_v61 = vld [vmem:[%s1011_s1 + $0x70] sm:$0xff] (!%p188_p2)   ;;  %vm612_vm9 = vcmask (!%p188_p2), 261120   ;;  %vm657_vm10 = vcmask (!%p188_p2), 121856  }
   0xa   : > { %v847_v1 = vld [vmem:[%s1011_s1 + $0x30] sm:$0xff] (!%p188_p2)  }
   0xb   : > { %778 = vmatpush3.bf16.msra.mxu0 (!%p188_p2), %v831_v3  ;;  %v848_v3 = vld [vmem:[%s1011_s1 + $0x78] sm:$0xff] (!%p188_p2)  }
   0xc   : > { %779 = vmatprep.subr.bf16.mxu0 (!%p188_p2), %v832_v4 }
   0xd   : > { %s1017_s19 = smov (!%p215_p3, %s715_s19), 1 }
   0xe   : > { %s808_s26 = smul.u32 20, %s1017_s19 }
   0xf   : > { %780 = vmatpush3.bf16.msra.mxu0 %v833_v6 }
  0x10   : > { %s922_s8 = scalar_lea.vmem %s1010_s0, %s808_s26  ;;  %781 = vmatprep.subr.bf16.mxu0 %v835_v8 }
  0x11   : > { %v820_v5 = vld [vmem:[%s922_s8 + $0xc] ss:$0 sps:$4 sm:$0x77]   ;;  %v821_v7 = vld [vmem:[%s922_s8 + $0x4] ss:$0 sps:$4 sm:$0x77]  }
  0x12   : > { %v381_v9 = vshrl.u32 %v820_v5, 16  ;;  %v384_v10 = vshll.u32 %v820_v5, 16  ;;  %v350_v11 = vshrl.u32 %v821_v7, 16  ;;  %v352_v12 = vshll.u32 %v821_v7, 16  ;;  %v736_v52 = vld [vmem:[%s922_s8 + $0x4] sm:$0x3] }
  0x13   : > { %v822_v13 = vld [vmem:[%s922_s8 + $0x10] ss:$0 sps:$4 sm:$0x77]   ;;  %v823_v16 = vld [vmem:[%s922_s8 + $0x8] ss:$0 sps:$4 sm:$0x77]   ;;  %782 = vmatpush3.bf16.msra.mxu0 %v836_v20 }
  0x14   : > { %v383_v14 = vrot.slane %v381_v9, 4  ;;  %v386_v15 = vrot.slane %v384_v10, 5  ;;  %v354_v17 = vrot.slane %v352_v12, 1  ;;  %v397_v18 = vshrl.u32 %v822_v13, 16  ;;  %783 = vmatprep.subr.bf16.mxu0 %v839_v39  ;;  %323 = vst.msk [vmem:[#allocation2 + $0x8] sm:$0x3] %vm227_vm1, %v736_v52 }
  0x15   : > { %v400_v19 = vshll.u32 %v822_v13, 16  ;;  %v365_v22 = vshrl.u32 %v823_v16, 16  ;;  %v368_v23 = vshll.u32 %v823_v16, 16  ;;  %v824_v24 = vld [vmem:[%s922_s8 + $0x4] ss:$0 sps:$4 sm:$0x77]  }
  0x16   : > { %v387_v21 = vor.u32 %v386_v15, %v383_v14  ;;  %v355_v25 = vor.u32 %v354_v17, %v350_v11  ;;  %v399_v26 = vrot.slane %v397_v18, 2  ;;  %v276_v30 = vshrl.u32 %v824_v24, 16  ;;  %v825_v33 = vld [vmem:[%s922_s8] ss:$0 sps:$4 sm:$0x77]   ;;  %v849_v7 = vld [vmem:[%s1011_s1 + $0x38] sm:$0xff]  }
  0x17   : > { %v402_v27 = vrot.slane %v400_v19, 3  ;;  %v367_v28 = vrot.slane %v365_v22, 6  ;;  %v370_v29 = vrot.slane %v368_v23, 7  ;;  %v279_v31 = vshll.u32 %v824_v24, 16  ;;  %784 = vmatpush3.bf16.msra.mxu0 %v840_v48  ;;  %v226_v4 = vld [vmem:[%s922_s8] sm:$0x3] }
  0x18   : > { %388 = vrot.lane.b32.xlu1 %v387_v21, %s860_s15  ;;  %356 = vrot.lane.b32.xlu0 %v355_v25, %s860_s15  ;;  %v826_v34 = vld [vmem:[%s922_s8 + $0xc] ss:$0 sps:$4 sm:$0x77]   ;;  %v278_v36 = vrot.slane %v276_v30, 6  ;;  %v260_v40 = vshrl.u32 %v825_v33, 16  ;;  %v262_v41 = vshll.u32 %v825_v33, 16 }
  0x19   : > { %v403_v32 = vor.u32 %v402_v27, %v399_v26  ;;  %v371_v35 = vor.u32 %v370_v29, %v367_v28  ;;  %v281_v37 = vrot.slane %v279_v31, 7  ;;  %v827_v38 = vld [vmem:[%s922_s8 + $0x8] ss:$0 sps:$4 sm:$0x77]   ;;  %v310_v42 = vshrl.u32 %v826_v34, 16  ;;  %785 = vmatprep.subr.bf16.mxu0 %v842_v53  ;;  %v850_v20 = vld [vmem:[%s1013_s3] sm:$0xff]  }
  0x1a   : > { %v313_v43 = vshll.u32 %v826_v34, 16  ;;  %v293_v45 = vshrl.u32 %v827_v38, 16  ;;  %v296_v46 = vshll.u32 %v827_v38, 16  ;;  %v834_v47 = vld [vmem:[%s922_s8 + $0xc] ss:$0 sps:$4 sm:$0x33]  }
  0x1b   : > { %v282_v44 = vor.u32 %v281_v37, %v278_v36  ;;  %v264_v49 = vrot.slane %v262_v41, 1  ;;  %v312_v50 = vrot.slane %v310_v42, 2  ;;  %336 = vst.msk [vmem:[#allocation2 + $0x8] sm:$0x30] %vm244_vm0, %v834_v47  ;;  %786 = vmatpush3.bf16.msra.mxu0 %v843_v58  ;;  %v861_v21 = vmov 0.0   ;;  %v851_v22 = vld [vmem:[%s1013_s3 + $0x8] sm:$0xff]  }
  0x1c   : > { %404 = vrot.lane.b32.xlu1 %v403_v32, %s860_s15  ;;  %372 = vrot.lane.b32.xlu0 %v371_v35, %s860_s15  ;;  %v315_v51 = vrot.slane %v313_v43, 3  ;;  %v295_v54 = vrot.slane %v293_v45, 4  ;;  %v298_v55 = vrot.slane %v296_v46, 5  ;;  %v837_v57 = vld [vmem:[%s922_s8 + $0x10] ss:$0 sps:$4 sm:$0x33]  }
  0x1d   : > { %v265_v56 = vor.u32 %v264_v49, %v260_v40  ;;  %v838_v60 = vld [vmem:[%s922_s8 + $0x8] ss:$0 sps:$4 sm:$0x33]   ;;  %v342_v63 = vrot.slane %v837_v57, 2  ;;  %787 = vmatprep.subr.bf16.mxu0 %v846_v61  ;;  %228 = vst.msk [vmem:[#allocation2] sm:$0x3] %vm227_vm1, %v226_v4  ;;  %800 = vmatprep.subr.bf16.mxu1 %v861_v21 }
  0x1e   : > { %v316_v59 = vor.u32 %v315_v51, %v312_v50  ;;  %v299_v62 = vor.u32 %v298_v55, %v295_v54  ;;  %v328_v0 = vrot.slane %v838_v60, 6  ;;  %v841_v2 = vld [vmem:[%s922_s8 + $0x4] ss:$0 sps:$4 sm:$0x33]   ;;  %801 = vmatpush3.bf16.msra.mxu1 %v850_v20  ;;  %804 = vmatprep.mubr.msk.bf16.mxu1 %vm862_vm8, %v861_v21  ;;  %v751_v24 = vld [vmem:[%s1012_s2] ss:$0 sm:$0xff] }
  0x1f   : > { %344 = vst.msk [vmem:[#allocation2 + $0x8] sm:$0xc0] %vm253_vm2, %v342_v63  ;;  %v234_v5 = vrot.slane %v841_v2, 6  ;;  %v844_v6 = vld [vmem:[%s922_s8 + $0xc] ss:$0 sps:$4 sm:$0x33]   ;;  %788 = vmatpush3.bf16.msra.mxu0 %v847_v1  ;;  %802 = vmatprep.subr.bf16.mxu1 %v861_v21 }
  0x20   : > { %283 = vrot.lane.b32.xlu1 %v282_v44, %s860_s15  ;;  %266 = vrot.lane.b32.xlu0 %v265_v56, %s860_s15  ;;  %330 = vst.msk [vmem:[#allocation2 + $0x8] sm:$0xc] %vm236_vm3, %v328_v0  ;;  %v845_v8 = vld [vmem:[%s922_s8 + $0x8] ss:$0 sps:$4 sm:$0x33]   ;;  %v251_v9 = vrot.slane %v844_v6, 2 }
  0x21   : > { %237 = vst.msk [vmem:[#allocation2] sm:$0xc] %vm236_vm3, %v234_v5  ;;  %789 = vmatprep.subr.bf16.mxu0 %v848_v3  ;;  %v768_v35 = vld [vmem:[%s1014_s4] ss:$0 sm:$0xff] }
  0x22   : > { %245 = vst.msk [vmem:[#allocation2] sm:$0x30] %vm244_vm0, %v845_v8  ;;  %803 = vmatpush3.bf16.msra.mxu1 %v851_v22 }
  0x23   : > { %254 = vst.msk [vmem:[#allocation2] sm:$0xc0] %vm253_vm2, %v251_v9  ;;  %790 = vmatpush3.bf16.msra.mxu0 %v849_v7 }
  0x24   : > { %317 = vrot.lane.b32.xlu1 %v316_v59, %s860_s15  ;;  %300 = vrot.lane.b32.xlu0 %v299_v62, %s860_s15  ;;  %s774_s15 = sshll.u32 %s1017_s19, 4 }
  0x25   : > { %s224_s22 = scalar_lea.vmem %s1015_s5, %s774_s15 }
  0x8a   : > { %v389_v10 = vpop.permute.xlu1 %388  ;;  %v357_v11 = vpop.permute.xlu0 %356 }
  0x8b   : > { %391 = vst.msk [vmem:[#allocation2 + $0x8] sm:$0x30] %vm303_vm4, %v389_v10 }
  0x8c   : > { %359 = vst.msk [vmem:[#allocation2 + $0x8] sm:$0x3] %vm269_vm5, %v357_v11 }
  0x8e   : > { %v405_v12 = vpop.permute.xlu1 %404  ;;  %v373_v13 = vpop.permute.xlu0 %372 }
  0x8f   : > { %407 = vst.msk [vmem:[#allocation2 + $0x8] sm:$0xc0] %vm320_vm6, %v405_v12 }
  0x90   : > { %375 = vst.msk [vmem:[#allocation2 + $0x8] sm:$0xc] %vm286_vm7, %v373_v13 }
  0x92   : > { %v284_v14 = vpop.permute.xlu1 %283  ;;  %v267_v15 = vpop.permute.xlu0 %266 }
  0x93   : > { %287 = vst.msk [vmem:[#allocation2] sm:$0xc] %vm286_vm7, %v284_v14 }
  0x94   : > { %270 = vst.msk [vmem:[#allocation2] sm:$0x3] %vm269_vm5, %v267_v15 }
  0x96   : > { %v318_v16 = vpop.permute.xlu1 %317  ;;  %v301_v17 = vpop.permute.xlu0 %300 }
  0x97   : > { %321 = vst.msk [vmem:[#allocation2] sm:$0xc0] %vm320_vm6, %v318_v16  ;;  %v409_v18 = vld [vmem:[#allocation2 + $0x8] sm:$0xff] }
  0x98   : > { %304 = vst.msk [vmem:[#allocation2] sm:$0x30] %vm303_vm4, %v301_v17  ;;  %577 = vmatprep.mubr.bf16.mxu0 %v409_v18 }
  0x9f   : > { %v408_v19 = vld [vmem:[#allocation2] sm:$0xff] }
  0xa0   : > { %578 = vmatmul.mubr.bf16.vlgmr.msra.gmra.mrb[0].mxu0 %v408_v19 }
 0x173   : > { %v791_v23 = vpop.f32.mrb[0].mxu0 }
 0x174   : > { %v792_v25 = vpop.f32.mrb[1].mxu0 }
 0x175   : > { %v793_v26 = vadd.f32 %v792_v25, %v791_v23  ;;  %v794_v27 = vpop.f32.mrb[2].mxu0 }
 0x176   : > { %v795_v28 = vpop.f32.mrb[3].mxu0 }
 0x177   : > { %v580_v29 = vadd.f32 %v793_v26, %v751_v24  ;;  %v796_v30 = vadd.f32 %v795_v28, %v794_v27 }
 0x179   : > { %v583_v31 = vadd.f32 %v796_v30, %v751_v24  ;;  %v586_v32 = vmax.f32 %v580_v29, 0.0 }
 0x17b   : > { %v587_v33 = vmax.f32 %v583_v31, 0.0 }
 0x17d   : > { %v588_v34 = vpack.c.bf16 %v587_v33, %v586_v32 }
 0x17f   : > { %805 = vmatmul.mubr.msk.bf16.vlgmr.msra.gmra.mrb[0].mxu1 %vm612_vm9, %v588_v34 }
 0x252   : > { %v650_v36 = vpop.f32.mrb[0].mxu1 }
 0x253   : > { %v651_v37 = vadd.f32 %v768_v35, %v650_v36  ;;  %v806_v38 = vpop.f32.mrb[1].mxu1 }
 0x254   : > { %v653_v39 = vpop.f32.mrb[2].mxu1 }
 0x255   : > { %658 = vst.msk [vmem:[%s224_s22] sm:$0xff] %vm657_vm10, %v651_v37  ;;  %v654_v40 = vadd.f32 %v768_v35, %v653_v39  ;;  %v807_v41 = vpop.f32.mrb[3].mxu1 }
 0x257   : > { %659 = vst.msk [vmem:[%s224_s22 + $0x8] sm:$0xff] %vm657_vm10, %v654_v40 }
 0x258 PF: > { %s15_s18 = sadd.s32 1, %s858_s18  }
 0x259   : > { %p12_p4 = scmp.ge.s32.totalorder %s15_s18, 4  }
 0x25b   :  { %14 = sbr.rel (!%p12_p4) target bundleno = 1 (0x1), region = 74 }

</bundles_post_ra>
